<compile_context>
chip_gen: v5e
topology: v5e:2x2
jax: 0.10.0
libtpu: 0.0.40
codegen_flags: <defaults>
</compile_context>

<pallas_src>
import functools
import math

import jax
import jax.numpy as jnp
from jax.experimental import pallas as pl
from jax.experimental.pallas import tpu as pltpu


def _mlp_kernel(n_layers, x_ref, w_ref, b_ref, out_ref):
    """x_ref: (D, TN)  w_ref: (L, D, D)  b_ref: (L, D, 1)  out_ref: (n_output, TN)."""
    h = x_ref[...]                                     # (D, TN) f32, batch on lanes
    for i in range(n_layers):                          # fully unrolled (10 layers)
        w = w_ref[i]                                   # (D, D) padded weight, static index
        b = b_ref[i]                                   # (D, 1) bias, static leading index
        h = jnp.dot(w, h, preferred_element_type=jnp.float32) + b
        if i < n_layers - 1:                           # ReLU on hidden layers only,
            h = jnp.maximum(h, 0.0)                    # no activation on `predict`
    out_ref[...] = h[: out_ref.shape[0], :]            # (n_output, TN) lane-dense store


def pack_params(weights, biases):
    """One-time packing (hoist out of the hot path).

    weights[i]: (out_i, in_i) PyTorch Linear layout.  biases[i]: (out_i,).
    Returns w_stack (L, D, D) and b_stack (L, D, 1) with D = common padded width.
    """
    d = max(max(w.shape) for w in weights)
    d = ((d + 7) // 8) * 8                             # sublane-align
    padded_w = [jnp.pad(w, ((0, d - w.shape[0]), (0, d - w.shape[1]))) for w in weights]
    padded_b = [jnp.pad(b, (0, d - b.shape[0]))[:, None] for b in biases]
    w_stack = jnp.stack(padded_w).astype(jnp.float32)  # (L, D, D)
    b_stack = jnp.stack(padded_b).astype(jnp.float32)  # (L, D, 1)
    return w_stack, b_stack


@functools.partial(jax.jit, static_argnames=("n_output", "block_n"))
def mlp_forward(x, w_stack, b_stack, *, n_output, block_n=512):
    """x: (N, F) f32.  w_stack/b_stack from pack_params.  Returns (N, n_output)."""
    n, f = x.shape
    n_layers, d, _ = w_stack.shape

    # Lane-tile selection: one tile if the (128-rounded) batch is small, else stream
    # block_n-wide activation tiles over a 1-D "parallel" grid.
    n_128 = ((n + 127) // 128) * 128
    tn = min(block_n, n_128)
    n_pad = ((n + tn - 1) // tn) * tn
    grid = (n_pad // tn,)

    # Transpose + zero-pad activations so batch is the (lane) last dimension.
    x_t = jnp.zeros((d, n_pad), jnp.float32).at[:f, :n].set(x.T)

    flops = 2 * n_layers * d * d * n_pad
    bytes_accessed = 4 * (x_t.size + w_stack.size + b_stack.size + n_output * n_pad)

    out_t = pl.pallas_call(
        functools.partial(_mlp_kernel, n_layers),
        out_shape=jax.ShapeDtypeStruct((n_output, n_pad), jnp.float32),
        grid=grid,
        in_specs=[
            # Activation tiles stream along the grid.
            pl.BlockSpec((d, tn), lambda i: (0, i),
                         memory_space=pltpu.MemorySpace.VMEM),
            # Weight/bias slabs: constant index_map -> DMA'd once, VMEM-resident.
            pl.BlockSpec((n_layers, d, d), lambda i: (0, 0, 0),
                         memory_space=pltpu.MemorySpace.VMEM),
            pl.BlockSpec((n_layers, d, 1), lambda i: (0, 0, 0),
                         memory_space=pltpu.MemorySpace.VMEM),
        ],
        out_specs=pl.BlockSpec((n_output, tn), lambda i: (0, i),
                               memory_space=pltpu.MemorySpace.VMEM),
        compiler_params=pltpu.CompilerParams(
            dimension_semantics=("parallel",)),      # v7x: 2 TCs split the batch axis
        cost_estimate=pl.CostEstimate(
            flops=flops, transcendentals=0, bytes_accessed=bytes_accessed),
    )(x_t, w_stack, b_stack)

    return out_t[:, :n].T                              # back to (N, n_output)


def init_linear(key, fan_in, fan_out):
    """Deterministic PyTorch-style Linear init: U(-1/sqrt(fan_in), +1/sqrt(fan_in))."""
    kw, kb = jax.random.split(key)
    bound = 1.0 / math.sqrt(fan_in)
    w = jax.random.uniform(kw, (fan_out, fan_in), jnp.float32, -bound, bound)  # (out, in)
    b = jax.random.uniform(kb, (fan_out,), jnp.float32, -bound, bound)
    return w, b


def reference_forward(x, weights, biases):
    h = x
    for i, (w, b) in enumerate(zip(weights, biases)):
        # HIGHEST precision so the reference matches the full-f32 in-kernel matmul.
        h = jnp.dot(h, w.T, precision=jax.lax.Precision.HIGHEST) + b
        if i < len(weights) - 1:
            h = jnp.maximum(h, 0.0)
    return h


if __name__ == "__main__":
    # The surrounding script cats two extra scalar columns onto x, so n_feature is
    # small (4); n_hidden=32, n_output=1.  batch=1024 -> two 512-lane grid steps,
    # exercising the streamed-activation / VMEM-resident-weight path.
    n_feature, n_hidden, n_output = 4, 32, 1
    batch = 1024

    key = jax.random.PRNGKey(0)
    keys = jax.random.split(key, 11)

    x = 2.0 * jax.random.uniform(keys[0], (batch, n_feature), jnp.float32) - 1.0

    layer_dims = [(n_feature, n_hidden)] + [(n_hidden, n_hidden)] * 8 + [(n_hidden, n_output)]
    weights, biases = [], []
    for k, (fi, fo) in zip(keys[1:], layer_dims):
        w, b = init_linear(k, fi, fo)
        weights.append(w)
        biases.append(b)

    # One-time parameter packing (static across calls) -- hoisted out of the hot path.
    w_stack, b_stack = pack_params(weights, biases)

    out = mlp_forward(x, w_stack, b_stack, n_output=n_output)
    out = jax.block_until_ready(out)

    ref = reference_forward(x, weights, biases)
    assert out.shape == (batch, n_output)
    assert jnp.allclose(out, ref, atol=1e-4, rtol=1e-4), "mismatch vs reference"

    print("KERNEL_OK")
</pallas_src>

<mosaic_0001>
module attributes {stable_mosaic.version = 11 : i64} {
  func.func @_mlp_kernel(%arg0: i32, %arg1: memref<32x512xf32, #tpu.memory_space<vmem>>, %arg2: memref<10x32x32xf32, #tpu.memory_space<vmem>>, %arg3: memref<10x32x1xf32, #tpu.memory_space<vmem>>, %arg4: memref<1x512xf32, #tpu.memory_space<vmem>>) attributes {dimension_semantics = [#tpu.dimension_semantics<parallel>], iteration_bounds = array<i64: 2>, scalar_prefetch = 0 : i64, scratch_operands = 0 : i64, tpu.core_type = #tpu.core_type<tc>, window_params = [{transform_indices = @transform_0, window_bounds = array<i64: 32, 512>}, {pipeline_mode = #tpu.pipeline_mode<synchronous>, transform_indices = @transform_1, window_bounds = array<i64: 10, 32, 32>}, {pipeline_mode = #tpu.pipeline_mode<synchronous>, transform_indices = @transform_2, window_bounds = array<i64: 10, 32, 1>}, {transform_indices = @transform_3, window_bounds = array<i64: 1, 512>}]} {
    %c0 = arith.constant 0 : index
    %c0_0 = arith.constant 0 : index
    %0 = vector.load %arg1[%c0, %c0_0] : memref<32x512xf32, #tpu.memory_space<vmem>>, vector<32x512xf32>
    %c0_1 = arith.constant 0 : index
    %c0_2 = arith.constant 0 : index
    %c0_3 = arith.constant 0 : index
    %1 = vector.load %arg2[%c0_1, %c0_2, %c0_3] : memref<10x32x32xf32, #tpu.memory_space<vmem>>, vector<1x32x32xf32>
    %2 = vector.shape_cast %1 : vector<1x32x32xf32> to vector<32x32xf32>
    %c0_4 = arith.constant 0 : index
    %c0_5 = arith.constant 0 : index
    %c0_6 = arith.constant 0 : index
    %3 = vector.load %arg3[%c0_4, %c0_5, %c0_6] : memref<10x32x1xf32, #tpu.memory_space<vmem>>, vector<1x32x1xf32>
    %4 = vector.shape_cast %3 : vector<1x32x1xf32> to vector<32x1xf32>
    %cst = arith.constant dense<0.000000e+00> : vector<32x512xf32>
    %5 = tpu.matmul %2, %0, %cst {dimension_numbers = #tpu.dot_dimension_numbers<[1], [0], [0], [1], [0, 0, 1, 1], [], []>} : vector<32x32xf32>, vector<32x512xf32>, vector<32x512xf32> -> vector<32x512xf32>
    %6 = vector.broadcast %4 : vector<32x1xf32> to vector<32x512xf32>
    %7 = arith.addf %5, %6 : vector<32x512xf32>
    %cst_7 = arith.constant 0.000000e+00 : f32
    %8 = vector.broadcast %cst_7 : f32 to vector<32x512xf32>
    %9 = arith.maximumf %7, %8 : vector<32x512xf32>
    %c1 = arith.constant 1 : index
    %c0_8 = arith.constant 0 : index
    %c0_9 = arith.constant 0 : index
    %10 = vector.load %arg2[%c1, %c0_8, %c0_9] : memref<10x32x32xf32, #tpu.memory_space<vmem>>, vector<1x32x32xf32>
    %11 = vector.shape_cast %10 : vector<1x32x32xf32> to vector<32x32xf32>
    %c1_10 = arith.constant 1 : index
    %c0_11 = arith.constant 0 : index
    %c0_12 = arith.constant 0 : index
    %12 = vector.load %arg3[%c1_10, %c0_11, %c0_12] : memref<10x32x1xf32, #tpu.memory_space<vmem>>, vector<1x32x1xf32>
    %13 = vector.shape_cast %12 : vector<1x32x1xf32> to vector<32x1xf32>
    %cst_13 = arith.constant dense<0.000000e+00> : vector<32x512xf32>
    %14 = tpu.matmul %11, %9, %cst_13 {dimension_numbers = #tpu.dot_dimension_numbers<[1], [0], [0], [1], [0, 0, 1, 1], [], []>} : vector<32x32xf32>, vector<32x512xf32>, vector<32x512xf32> -> vector<32x512xf32>
    %15 = vector.broadcast %13 : vector<32x1xf32> to vector<32x512xf32>
    %16 = arith.addf %14, %15 : vector<32x512xf32>
    %cst_14 = arith.constant 0.000000e+00 : f32
    %17 = vector.broadcast %cst_14 : f32 to vector<32x512xf32>
    %18 = arith.maximumf %16, %17 : vector<32x512xf32>
    %c2 = arith.constant 2 : index
    %c0_15 = arith.constant 0 : index
    %c0_16 = arith.constant 0 : index
    %19 = vector.load %arg2[%c2, %c0_15, %c0_16] : memref<10x32x32xf32, #tpu.memory_space<vmem>>, vector<1x32x32xf32>
    %20 = vector.shape_cast %19 : vector<1x32x32xf32> to vector<32x32xf32>
    %c2_17 = arith.constant 2 : index
    %c0_18 = arith.constant 0 : index
    %c0_19 = arith.constant 0 : index
    %21 = vector.load %arg3[%c2_17, %c0_18, %c0_19] : memref<10x32x1xf32, #tpu.memory_space<vmem>>, vector<1x32x1xf32>
    %22 = vector.shape_cast %21 : vector<1x32x1xf32> to vector<32x1xf32>
    %cst_20 = arith.constant dense<0.000000e+00> : vector<32x512xf32>
    %23 = tpu.matmul %20, %18, %cst_20 {dimension_numbers = #tpu.dot_dimension_numbers<[1], [0], [0], [1], [0, 0, 1, 1], [], []>} : vector<32x32xf32>, vector<32x512xf32>, vector<32x512xf32> -> vector<32x512xf32>
    %24 = vector.broadcast %22 : vector<32x1xf32> to vector<32x512xf32>
    %25 = arith.addf %23, %24 : vector<32x512xf32>
    %cst_21 = arith.constant 0.000000e+00 : f32
    %26 = vector.broadcast %cst_21 : f32 to vector<32x512xf32>
    %27 = arith.maximumf %25, %26 : vector<32x512xf32>
    %c3 = arith.constant 3 : index
    %c0_22 = arith.constant 0 : index
    %c0_23 = arith.constant 0 : index
    %28 = vector.load %arg2[%c3, %c0_22, %c0_23] : memref<10x32x32xf32, #tpu.memory_space<vmem>>, vector<1x32x32xf32>
    %29 = vector.shape_cast %28 : vector<1x32x32xf32> to vector<32x32xf32>
    %c3_24 = arith.constant 3 : index
    %c0_25 = arith.constant 0 : index
    %c0_26 = arith.constant 0 : index
    %30 = vector.load %arg3[%c3_24, %c0_25, %c0_26] : memref<10x32x1xf32, #tpu.memory_space<vmem>>, vector<1x32x1xf32>
    %31 = vector.shape_cast %30 : vector<1x32x1xf32> to vector<32x1xf32>
    %cst_27 = arith.constant dense<0.000000e+00> : vector<32x512xf32>
    %32 = tpu.matmul %29, %27, %cst_27 {dimension_numbers = #tpu.dot_dimension_numbers<[1], [0], [0], [1], [0, 0, 1, 1], [], []>} : vector<32x32xf32>, vector<32x512xf32>, vector<32x512xf32> -> vector<32x512xf32>
    %33 = vector.broadcast %31 : vector<32x1xf32> to vector<32x512xf32>
    %34 = arith.addf %32, %33 : vector<32x512xf32>
    %cst_28 = arith.constant 0.000000e+00 : f32
    %35 = vector.broadcast %cst_28 : f32 to vector<32x512xf32>
    %36 = arith.maximumf %34, %35 : vector<32x512xf32>
    %c4 = arith.constant 4 : index
    %c0_29 = arith.constant 0 : index
    %c0_30 = arith.constant 0 : index
    %37 = vector.load %arg2[%c4, %c0_29, %c0_30] : memref<10x32x32xf32, #tpu.memory_space<vmem>>, vector<1x32x32xf32>
    %38 = vector.shape_cast %37 : vector<1x32x32xf32> to vector<32x32xf32>
    %c4_31 = arith.constant 4 : index
    %c0_32 = arith.constant 0 : index
    %c0_33 = arith.constant 0 : index
    %39 = vector.load %arg3[%c4_31, %c0_32, %c0_33] : memref<10x32x1xf32, #tpu.memory_space<vmem>>, vector<1x32x1xf32>
    %40 = vector.shape_cast %39 : vector<1x32x1xf32> to vector<32x1xf32>
    %cst_34 = arith.constant dense<0.000000e+00> : vector<32x512xf32>
    %41 = tpu.matmul %38, %36, %cst_34 {dimension_numbers = #tpu.dot_dimension_numbers<[1], [0], [0], [1], [0, 0, 1, 1], [], []>} : vector<32x32xf32>, vector<32x512xf32>, vector<32x512xf32> -> vector<32x512xf32>
    %42 = vector.broadcast %40 : vector<32x1xf32> to vector<32x512xf32>
    %43 = arith.addf %41, %42 : vector<32x512xf32>
    %cst_35 = arith.constant 0.000000e+00 : f32
    %44 = vector.broadcast %cst_35 : f32 to vector<32x512xf32>
    %45 = arith.maximumf %43, %44 : vector<32x512xf32>
    %c5 = arith.constant 5 : index
    %c0_36 = arith.constant 0 : index
    %c0_37 = arith.constant 0 : index
    %46 = vector.load %arg2[%c5, %c0_36, %c0_37] : memref<10x32x32xf32, #tpu.memory_space<vmem>>, vector<1x32x32xf32>
    %47 = vector.shape_cast %46 : vector<1x32x32xf32> to vector<32x32xf32>
    %c5_38 = arith.constant 5 : index
    %c0_39 = arith.constant 0 : index
    %c0_40 = arith.constant 0 : index
    %48 = vector.load %arg3[%c5_38, %c0_39, %c0_40] : memref<10x32x1xf32, #tpu.memory_space<vmem>>, vector<1x32x1xf32>
    %49 = vector.shape_cast %48 : vector<1x32x1xf32> to vector<32x1xf32>
    %cst_41 = arith.constant dense<0.000000e+00> : vector<32x512xf32>
    %50 = tpu.matmul %47, %45, %cst_41 {dimension_numbers = #tpu.dot_dimension_numbers<[1], [0], [0], [1], [0, 0, 1, 1], [], []>} : vector<32x32xf32>, vector<32x512xf32>, vector<32x512xf32> -> vector<32x512xf32>
    %51 = vector.broadcast %49 : vector<32x1xf32> to vector<32x512xf32>
    %52 = arith.addf %50, %51 : vector<32x512xf32>
    %cst_42 = arith.constant 0.000000e+00 : f32
    %53 = vector.broadcast %cst_42 : f32 to vector<32x512xf32>
    %54 = arith.maximumf %52, %53 : vector<32x512xf32>
    %c6 = arith.constant 6 : index
    %c0_43 = arith.constant 0 : index
    %c0_44 = arith.constant 0 : index
    %55 = vector.load %arg2[%c6, %c0_43, %c0_44] : memref<10x32x32xf32, #tpu.memory_space<vmem>>, vector<1x32x32xf32>
    %56 = vector.shape_cast %55 : vector<1x32x32xf32> to vector<32x32xf32>
    %c6_45 = arith.constant 6 : index
    %c0_46 = arith.constant 0 : index
    %c0_47 = arith.constant 0 : index
    %57 = vector.load %arg3[%c6_45, %c0_46, %c0_47] : memref<10x32x1xf32, #tpu.memory_space<vmem>>, vector<1x32x1xf32>
    %58 = vector.shape_cast %57 : vector<1x32x1xf32> to vector<32x1xf32>
    %cst_48 = arith.constant dense<0.000000e+00> : vector<32x512xf32>
    %59 = tpu.matmul %56, %54, %cst_48 {dimension_numbers = #tpu.dot_dimension_numbers<[1], [0], [0], [1], [0, 0, 1, 1], [], []>} : vector<32x32xf32>, vector<32x512xf32>, vector<32x512xf32> -> vector<32x512xf32>
    %60 = vector.broadcast %58 : vector<32x1xf32> to vector<32x512xf32>
    %61 = arith.addf %59, %60 : vector<32x512xf32>
    %cst_49 = arith.constant 0.000000e+00 : f32
    %62 = vector.broadcast %cst_49 : f32 to vector<32x512xf32>
    %63 = arith.maximumf %61, %62 : vector<32x512xf32>
    %c7 = arith.constant 7 : index
    %c0_50 = arith.constant 0 : index
    %c0_51 = arith.constant 0 : index
    %64 = vector.load %arg2[%c7, %c0_50, %c0_51] : memref<10x32x32xf32, #tpu.memory_space<vmem>>, vector<1x32x32xf32>
    %65 = vector.shape_cast %64 : vector<1x32x32xf32> to vector<32x32xf32>
    %c7_52 = arith.constant 7 : index
    %c0_53 = arith.constant 0 : index
    %c0_54 = arith.constant 0 : index
    %66 = vector.load %arg3[%c7_52, %c0_53, %c0_54] : memref<10x32x1xf32, #tpu.memory_space<vmem>>, vector<1x32x1xf32>
    %67 = vector.shape_cast %66 : vector<1x32x1xf32> to vector<32x1xf32>
    %cst_55 = arith.constant dense<0.000000e+00> : vector<32x512xf32>
    %68 = tpu.matmul %65, %63, %cst_55 {dimension_numbers = #tpu.dot_dimension_numbers<[1], [0], [0], [1], [0, 0, 1, 1], [], []>} : vector<32x32xf32>, vector<32x512xf32>, vector<32x512xf32> -> vector<32x512xf32>
    %69 = vector.broadcast %67 : vector<32x1xf32> to vector<32x512xf32>
    %70 = arith.addf %68, %69 : vector<32x512xf32>
    %cst_56 = arith.constant 0.000000e+00 : f32
    %71 = vector.broadcast %cst_56 : f32 to vector<32x512xf32>
    %72 = arith.maximumf %70, %71 : vector<32x512xf32>
    %c8 = arith.constant 8 : index
    %c0_57 = arith.constant 0 : index
    %c0_58 = arith.constant 0 : index
    %73 = vector.load %arg2[%c8, %c0_57, %c0_58] : memref<10x32x32xf32, #tpu.memory_space<vmem>>, vector<1x32x32xf32>
    %74 = vector.shape_cast %73 : vector<1x32x32xf32> to vector<32x32xf32>
    %c8_59 = arith.constant 8 : index
    %c0_60 = arith.constant 0 : index
    %c0_61 = arith.constant 0 : index
    %75 = vector.load %arg3[%c8_59, %c0_60, %c0_61] : memref<10x32x1xf32, #tpu.memory_space<vmem>>, vector<1x32x1xf32>
    %76 = vector.shape_cast %75 : vector<1x32x1xf32> to vector<32x1xf32>
    %cst_62 = arith.constant dense<0.000000e+00> : vector<32x512xf32>
    %77 = tpu.matmul %74, %72, %cst_62 {dimension_numbers = #tpu.dot_dimension_numbers<[1], [0], [0], [1], [0, 0, 1, 1], [], []>} : vector<32x32xf32>, vector<32x512xf32>, vector<32x512xf32> -> vector<32x512xf32>
    %78 = vector.broadcast %76 : vector<32x1xf32> to vector<32x512xf32>
    %79 = arith.addf %77, %78 : vector<32x512xf32>
    %cst_63 = arith.constant 0.000000e+00 : f32
    %80 = vector.broadcast %cst_63 : f32 to vector<32x512xf32>
    %81 = arith.maximumf %79, %80 : vector<32x512xf32>
    %c9 = arith.constant 9 : index
    %c0_64 = arith.constant 0 : index
    %c0_65 = arith.constant 0 : index
    %82 = vector.load %arg2[%c9, %c0_64, %c0_65] : memref<10x32x32xf32, #tpu.memory_space<vmem>>, vector<1x32x32xf32>
    %83 = vector.shape_cast %82 : vector<1x32x32xf32> to vector<32x32xf32>
    %c9_66 = arith.constant 9 : index
    %c0_67 = arith.constant 0 : index
    %c0_68 = arith.constant 0 : index
    %84 = vector.load %arg3[%c9_66, %c0_67, %c0_68] : memref<10x32x1xf32, #tpu.memory_space<vmem>>, vector<1x32x1xf32>
    %85 = vector.shape_cast %84 : vector<1x32x1xf32> to vector<32x1xf32>
    %cst_69 = arith.constant dense<0.000000e+00> : vector<32x512xf32>
    %86 = tpu.matmul %83, %81, %cst_69 {dimension_numbers = #tpu.dot_dimension_numbers<[1], [0], [0], [1], [0, 0, 1, 1], [], []>} : vector<32x32xf32>, vector<32x512xf32>, vector<32x512xf32> -> vector<32x512xf32>
    %87 = vector.broadcast %85 : vector<32x1xf32> to vector<32x512xf32>
    %88 = arith.addf %86, %87 : vector<32x512xf32>
    %89 = vector.extract_strided_slice %88 {offsets = [0, 0], sizes = [1, 512], strides = [1, 1]} : vector<32x512xf32> to vector<1x512xf32>
    %c0_70 = arith.constant 0 : index
    %c0_71 = arith.constant 0 : index
    %90 = vector.load %arg4[%c0_70, %c0_71] : memref<1x512xf32, #tpu.memory_space<vmem>>, vector<1x512xf32>
    tpu.vector_store %arg4[%c0_70, %c0_71], %89 {strides = array<i32>} : memref<1x512xf32, #tpu.memory_space<vmem>>, vector<1x512xf32>,
    return
  }
  func.func @transform_0(%arg0: i32) -> (i32, i32) {
    %c0_i32 = arith.constant 0 : i32
    %c0_i32_0 = arith.constant 0 : i32
    return %c0_i32, %arg0 : i32, i32
  }
  func.func @transform_1(%arg0: i32) -> (i32, i32, i32) {
    %c0_i32 = arith.constant 0 : i32
    %c0_i32_0 = arith.constant 0 : i32
    %c0_i32_1 = arith.constant 0 : i32
    %c0_i32_2 = arith.constant 0 : i32
    return %c0_i32, %c0_i32_0, %c0_i32_1 : i32, i32, i32
  }
  func.func @transform_2(%arg0: i32) -> (i32, i32, i32) {
    %c0_i32 = arith.constant 0 : i32
    %c0_i32_0 = arith.constant 0 : i32
    %c0_i32_1 = arith.constant 0 : i32
    %c0_i32_2 = arith.constant 0 : i32
    return %c0_i32, %c0_i32_0, %c0_i32_1 : i32, i32, i32
  }
  func.func @transform_3(%arg0: i32) -> (i32, i32) {
    %c0_i32 = arith.constant 0 : i32
    %c0_i32_0 = arith.constant 0 : i32
    return %c0_i32, %arg0 : i32, i32
  }
}

</mosaic_0001>

<bundles_post_ra>
// kernel: mlp_forward.1
= control target key start
LH: loop header
LB: loop body
LE: loop exit
PB: predicated region body
PF: predicated region fallthrough
CT: control target
= control target key end

     0   :  { %8 = vsyncpa [#allocation4], 0  ;;  %s2944_s0 = inlined_call_operand.vmem [shape: f32[32,1024], index: 0, kind: input, shape index: {}]   ;;  %s2945_s1 = inlined_call_operand.vmem [shape: f32[10,32,32], index: 1, kind: input, shape index: {}]   ;;  %s2946_s2 = inlined_call_operand.vmem [shape: f32[10,32,1], index: 2, kind: input, shape index: {}]   ;;  %s2947_s3 = inlined_call_operand.hbm [shape: f32[1,1024], index: 3, kind: output, shape index: {}]  }
   0x1   :  { %10 = vsyncpa [#allocation4 + $0x1], 0  ;;  %s2419_s12 = smov 0   ;;  %s2421_s13 = smov 0  }
   0x2   :  { %s2423_s14 = smov 0   ;;  %s2425_s15 = smov 0  }
   0x3 LB: > { %s2044_s16 = sadd.s32 4294967295, %s2396_s15   ;;  %s2045_s17 = sadd.s32 4294967294, %s2396_s15   ;;  %s2396_s15 = sphi %s2425_s15, %s2953_s15   ;;  %s2392_s14 = sphi %s2423_s14, %s2952_s14   ;;  %s2388_s13 = sphi %s2421_s13, %s2951_s13   ;;  %s2384_s12 = sphi %s2419_s12, %s2950_s12  }
   0x4   : > { %s2442_s18 = sadd.s32 1, %s2396_s15   ;;  %s23_s19 = sadd.s32 1, %s2392_s14 }
   0x5   : > { %s20_s20 = ssub.s32 %s2396_s15, %s2442_s18  ;;  %p30_p0 = scmp.ne.s32.totalorder %s2392_s14, %s2388_s13 }
   0x6   : > { %p21_p1 = scmp.eq.s32.totalorder %s20_s20, 0  ;;  %p31_p2 = scmp.eq.s32.totalorder %s2396_s15, 0 }
   0x7   : > { %p102_p3 = scmp.eq.s32.totalorder %s2044_s16, 1  ;;  %p107_p4 = scmp.ne.s32.totalorder %s2388_s13, %s2384_s12 }
   0x8   : > { %s2455_s21 = scalar_select %p21_p1, %s2392_s14, %s23_s19  }
   0x9   : > { %p32_p5 = por %p31_p2, %p30_p0  ;;  %p2457_p6 = por %p102_p3, %p30_p0 }
   0xa   : > { %p108_p7 = scmp.eq.s32.totalorder %s2045_s17, 1  ;;  %p2047_p9 = scmp.ge.s32.totalorder %s2396_s15, 2 }
   0xc   : > { %p2461_p8 = por %p108_p7, %p107_p4  ;;  %130 = sbr.rel (%p2047_p9) target bundleno = 37 (0x25), region = 24 }
  0x11   : > { %133 = sbr.rel (!%p32_p5) target bundleno = 37 (0x25), region = 28  ;;  %s135_s24 = sand.u32 (%p32_p5), 1, %s2392_s14  }
  0x12   : > { %s2290_s25 = sshll.u32 (%p32_p5), %s2396_s15, 5  ;;  %s2048_s26 = sshll.u32 (%p32_p5), %s135_s24, 7 }
  0x13   : > { %s2473_s29 = scalar_lea.vmem (%p32_p5), %s2944_s0, %s2290_s25  ;;  %s137_s30 = scalar_lea.vmem (%p32_p5), [#allocation2], %s2048_s26 }
  0x14   : > { %v153_v0 = vld [vmem:[%s2473_s29] sm:$0xff] (%p32_p5)  ;;  %v155_v1 = vld [vmem:[%s2473_s29 + $0x8] sm:$0xff] (%p32_p5)  ;;  %v157_v2 = vld [vmem:[%s2473_s29 + $0x10] sm:$0xff] (%p32_p5) }
  0x15   : > { %154 = vst [vmem:[%s137_s30] sm:$0xff] (%p32_p5), %v153_v0  ;;  %v159_v3 = vld [vmem:[%s2473_s29 + $0x18] sm:$0xff] (%p32_p5)  ;;  %v161_v4 = vld [vmem:[%s2473_s29 + $0x40] sm:$0xff] (%p32_p5)  ;;  %v163_v5 = vld [vmem:[%s2473_s29 + $0x48] sm:$0xff] (%p32_p5) }
  0x16   : > { %156 = vst [vmem:[%s137_s30 + $0x8] sm:$0xff] %v155_v1  ;;  %v165_v6 = vld [vmem:[%s2473_s29 + $0x50] sm:$0xff]  ;;  %v167_v7 = vld [vmem:[%s2473_s29 + $0x58] sm:$0xff]  ;;  %v169_v8 = vld [vmem:[%s2473_s29 + $0x80] sm:$0xff] }
  0x17   : > { %158 = vst [vmem:[%s137_s30 + $0x10] sm:$0xff] %v157_v2  ;;  %v171_v9 = vld [vmem:[%s2473_s29 + $0x88] sm:$0xff]  ;;  %v173_v10 = vld [vmem:[%s2473_s29 + $0x90] sm:$0xff]  ;;  %v175_v11 = vld [vmem:[%s2473_s29 + $0x98] sm:$0xff] }
  0x18   : > { %160 = vst [vmem:[%s137_s30 + $0x18] sm:$0xff] %v159_v3  ;;  %v177_v12 = vld [vmem:[%s2473_s29 + $0xc0] sm:$0xff]  ;;  %v179_v13 = vld [vmem:[%s2473_s29 + $0xc8] sm:$0xff]  ;;  %v181_v14 = vld [vmem:[%s2473_s29 + $0xd0] sm:$0xff] }
  0x19   : > { %162 = vst [vmem:[%s137_s30 + $0x20] sm:$0xff] %v161_v4  ;;  %v183_v15 = vld [vmem:[%s2473_s29 + $0xd8] sm:$0xff] }
  0x1a   : > { %164 = vst [vmem:[%s137_s30 + $0x28] sm:$0xff] %v163_v5 }
  0x1b   : > { %166 = vst [vmem:[%s137_s30 + $0x30] sm:$0xff] %v165_v6 }
  0x1c   : > { %168 = vst [vmem:[%s137_s30 + $0x38] sm:$0xff] %v167_v7 }
  0x1d   : > { %170 = vst [vmem:[%s137_s30 + $0x40] sm:$0xff] %v169_v8 }
  0x1e   : > { %172 = vst [vmem:[%s137_s30 + $0x48] sm:$0xff] %v171_v9 }
  0x1f   : > { %174 = vst [vmem:[%s137_s30 + $0x50] sm:$0xff] %v173_v10 }
  0x20   : > { %176 = vst [vmem:[%s137_s30 + $0x58] sm:$0xff] %v175_v11 }
  0x21   : > { %178 = vst [vmem:[%s137_s30 + $0x60] sm:$0xff] %v177_v12 }
  0x22   : > { %180 = vst [vmem:[%s137_s30 + $0x68] sm:$0xff] %v179_v13 }
  0x23   : > { %182 = vst [vmem:[%s137_s30 + $0x70] sm:$0xff] %v181_v14 }
  0x24   : > { %184 = vst [vmem:[%s137_s30 + $0x78] sm:$0xff] %v183_v15 }
  0x25 PF: > { %p2051_p10 = scmp.ge.s32.totalorder %s2396_s15, 1  ;;  %p189_p11 = scmp.lt.s32.totalorder %s2396_s15, 3 }
  0x27   : > { %p190_p12 = pnand %p2051_p10, %p189_p11 }
  0x28   : > { %s2500_s8 = sand.u32 (!%p190_p12), 1, %s2388_s13   ;;  %s2287_s7 = sshll.u32 (!%p190_p12), %s2044_s16, 2 }
  0x29   : > { %193 = sbr.rel (%p190_p12) target bundleno = 1720 (0x6b8), region = 51  ;;  %s2052_s9 = sshll.u32 (!%p190_p12), %s2500_s8, 7 }
  0x2a   : > { %s2503_s10 = scalar_lea.vmem (!%p190_p12), [#allocation2], %s2052_s9  ;;  %s2053_s9 = sshll.u32 (!%p190_p12), %s2500_s8, 2 }
  0x2b   : > { %s1975_s17 = scalar_lea.hbm (!%p190_p12), %s2947_s3, %s2287_s7  ;;  %s218_s19 = scalar_lea.vmem (!%p190_p12), [#allocation3], %s2053_s9 }
  0x2c   : > { %s1977_s20 = sshll.u32 (!%p190_p12), %s218_s19, 4  ;;  %s2912_s24 = sshll.u32 (!%p190_p12), %s1975_s17, 4  ;;  %s1978_s20 = int_to_ptr.vmem [resolvable:$true] %s1977_s20  ;;  %s1980_s24 = int_to_ptr.hbm [resolvable:$true] %s2912_s24 }
  0x2d   : > { %s1965_s16 = scalar_lea.sflag (!%p190_p12), [#allocation4], %s2500_s8  ;;  %s2348_s25 = sshra.s32 (!%p190_p12), %s1980_s24, 4  ;;  %s2349_s25 = int_to_ptr.hbm [resolvable:$true] %s2348_s25 }
  0x2e   : > { %v244_v16 = vld [vmem:[%s2946_s2 + $0x18] sm:$0xff]  ;;  %v242_v17 = vld [vmem:[%s2946_s2 + $0x8] sm:$0xff]  ;;  %v2398_v18 = vmov 0   ;;  %v233_v19 = vld [vmem:[%s2503_s10 + $0x60] sm:$0xff]  ;;  %vm265_vm0 = vcmask 261120   ;;  %vm1952_vm1 = vcmask 1040384   ;;  %p2355_p2 = scmp.lt.s32.totalorder %s2349_s25, %s2947_s3 }
  0x2f   : > { %2332 = vset.pattern.permute.xlu1 %v2398_v18  ;;  %2331 = vset.pattern.permute.xlu0 %v2398_v18  ;;  %v234_v20 = vld [vmem:[%s2503_s10 + $0x68] sm:$0xff]  ;;  %v235_v21 = vld [vmem:[%s2503_s10 + $0x70] sm:$0xff]  ;;  %v236_v22 = vld [vmem:[%s2503_s10 + $0x78] sm:$0xff]  ;;  %vm1954_vm2 = vcmask 1042434   ;;  %vm1956_vm3 = vcmask 1041408   ;;  %s2350_s26 = scalar_lea.hbm %s2349_s25, 4 }
  0x30   : > { %262 = vperm.xlu0 %2331, %v244_v16   ;;  %252 = vperm.xlu1 %2332, %v242_v17   ;;  %v229_v23 = vld [vmem:[%s2503_s10 + $0x40] sm:$0xff]  ;;  %v230_v24 = vld [vmem:[%s2503_s10 + $0x48] sm:$0xff]  ;;  %v231_v25 = vld [vmem:[%s2503_s10 + $0x50] sm:$0xff]  ;;  %p2351_p13 = scmp.ne.s32.totalorder %s2349_s25, %s2350_s26  ;;  %s2354_s29 = scalar_lea.hbm %s2947_s3, 8 }
  0x31   : > { %2333 = vset.pattern.permute.xlu2 %v2398_v18  ;;  %290 = vmatpush.msra.mxu0 %v233_v19  ;;  %v232_v26 = vld [vmem:[%s2503_s10 + $0x58] sm:$0xff]  ;;  %v225_v27 = vld [vmem:[%s2503_s10 + $0x20] sm:$0xff]  ;;  %v226_v28 = vld [vmem:[%s2503_s10 + $0x28] sm:$0xff]  ;;  %p2356_p3 = scmp.lt.s32.totalorder %s2354_s29, %s2350_s26 }
  0x32   : > { %319 = vmatpush.msra.mxu1 %v234_v20  ;;  %348 = vmatpush.msra.mxu2 %v235_v21  ;;  %v227_v29 = vld [vmem:[%s2503_s10 + $0x30] sm:$0xff]  ;;  %v228_v30 = vld [vmem:[%s2503_s10 + $0x38] sm:$0xff]  ;;  %v241_v32 = vld [vmem:[%s2946_s2] sm:$0xff]  ;;  %p2352_p0 = pnand %p2351_p13, %p2457_p6 }
  0x33   : > { %377 = vmatpush.msra.mxu3 %v236_v22  ;;  %291 = vmatpush.msra.mxu0 %v229_v23  ;;  %v243_v31 = vld [vmem:[%s2946_s2 + $0x10] sm:$0xff]  ;;  %v221_v33 = vld [vmem:[%s2503_s10] sm:$0xff]  ;;  %v222_v34 = vld [vmem:[%s2503_s10 + $0x8] sm:$0xff]  ;;  %p2357_p4 = por %p2356_p3, %p2355_p2 }
  0x34   : > { %320 = vmatpush.msra.mxu1 %v230_v24  ;;  %349 = vmatpush.msra.mxu2 %v231_v25  ;;  %v223_v35 = vld [vmem:[%s2503_s10 + $0x10] sm:$0xff]  ;;  %v224_v36 = vld [vmem:[%s2503_s10 + $0x18] sm:$0xff]  ;;  %v237_v37 = vld [vmem:[%s2945_s1] sm:$0xff]  ;;  %p2353_p1 = pneg %p2352_p0 }
  0x35   : > { %378 = vmatpush.msra.mxu3 %v232_v26  ;;  %292 = vmatpush.msra.mxu0 %v225_v27  ;;  %v2075_v38 = vld [vmem:[%s2946_s2 + $0x28] sm:$0xff]  ;;  %v2074_v39 = vld [vmem:[%s2946_s2 + $0x20] sm:$0xff]  ;;  %v2100_v41 = vld [vmem:[%s2946_s2 + $0x50] sm:$0xff] }
  0x36   : > { %321 = vmatpush.msra.mxu1 %v226_v28  ;;  %350 = vmatpush.msra.mxu2 %v227_v29  ;;  %v238_v40 = vld [vmem:[%s2945_s1 + $0x8] sm:$0xff]  ;;  %v239_v43 = vld [vmem:[%s2945_s1 + $0x10] sm:$0xff]  ;;  %v2125_v44 = vld [vmem:[%s2946_s2 + $0x78] sm:$0xff]  ;;  %p2358_p5 = pnand %p2357_p4, %p2353_p1 }
  0x37   : > { %379 = vmatpush.msra.mxu3 %v228_v30  ;;  %293 = vmatpush.msra.mxu0 %v221_v33  ;;  %v2099_v42 = vld [vmem:[%s2946_s2 + $0x48] sm:$0xff]  ;;  %v2124_v45 = vld [vmem:[%s2946_s2 + $0x70] sm:$0xff]  ;;  %v240_v46 = vld [vmem:[%s2945_s1 + $0x18] sm:$0xff] }
  0x38   : > { %257 = vperm.xlu0 %2331, %v243_v31   ;;  %247 = vperm.xlu1 %2332, %v241_v32   ;;  %v2122_v47 = vld [vmem:[%s2946_s2 + $0x60] sm:$0xff]  ;;  %v2149_v48 = vld [vmem:[%s2946_s2 + $0x98] sm:$0xff]  ;;  %v2147_v49 = vld [vmem:[%s2946_s2 + $0x88] sm:$0xff] }
  0x39   : > { %322 = vmatpush.msra.mxu1 %v222_v34  ;;  %351 = vmatpush.msra.mxu2 %v223_v35  ;;  %v2146_v50 = vld [vmem:[%s2946_s2 + $0x80] sm:$0xff]  ;;  %v2172_v51 = vld [vmem:[%s2946_s2 + $0xb0] sm:$0xff]  ;;  %v2171_v52 = vld [vmem:[%s2946_s2 + $0xa8] sm:$0xff] }
  0x3a   : > { %380 = vmatpush.msra.mxu3 %v224_v36  ;;  %2054 = vmatmul.msk.f32.vlgmr.msra.gmra.mxu0 %vm265_vm0, %v237_v37  ;;  %v2197_v53 = vld [vmem:[%s2946_s2 + $0xd8] sm:$0xff]  ;;  %v2196_v54 = vld [vmem:[%s2946_s2 + $0xd0] sm:$0xff]  ;;  %v2194_v55 = vld [vmem:[%s2946_s2 + $0xc0] sm:$0xff] }
  0x3b   : > { %2058 = vmatmul.msk.f32.vlgmr.msra.gmra.mxu1 %vm265_vm0, %v237_v37  ;;  %2062 = vmatmul.msk.f32.vlgmr.msra.gmra.mxu2 %vm265_vm0, %v237_v37  ;;  %v2221_v56 = vld [vmem:[%s2946_s2 + $0xf8] sm:$0xff]  ;;  %v2219_v57 = vld [vmem:[%s2946_s2 + $0xe8] sm:$0xff]  ;;  %v2218_v58 = vld [vmem:[%s2946_s2 + $0xe0] sm:$0xff] }
  0x3c   : > { %2066 = vmatmul.msk.f32.vlgmr.msra.gmra.mxu3 %vm265_vm0, %v237_v37  ;;  %v2244_v59 = vld [vmem:[%s2946_s2 + $0x110] sm:$0xff]  ;;  %v2243_v60 = vld [vmem:[%s2946_s2 + $0x108] sm:$0xff]  ;;  %v2266_v61 = vld [vmem:[%s2946_s2 + $0x120] sm:$0xff] }
  0x3d   : > { %v2077_v62 = vld [vmem:[%s2946_s2 + $0x38] sm:$0xff]  ;;  %v2076_v63 = vld [vmem:[%s2946_s2 + $0x30] sm:$0xff]  ;;  %v2098_v3 = vld [vmem:[%s2946_s2 + $0x40] sm:$0xff] }
  0x3e   : > { %437 = vperm.xlu2 %2333, %v2077_v62   ;;  %v2101_v0 = vld [vmem:[%s2946_s2 + $0x58] sm:$0xff]  ;;  %v2123_v9 = vld [vmem:[%s2946_s2 + $0x68] sm:$0xff]  ;;  %v2148_v15 = vld [vmem:[%s2946_s2 + $0x90] sm:$0xff] }
  0x3f   : > { %v2173_v36 = vld [vmem:[%s2946_s2 + $0xb8] sm:$0xff]  ;;  %v2220_v62 = vld [vmem:[%s2946_s2 + $0xf0] sm:$0xff] }
  0x40   : > { %427 = vperm.xlu0 %2331, %v2075_v38   ;;  %422 = vperm.xlu1 %2332, %v2074_v39  }
  0x42   : > { %2055 = vmatmul.msk.f32.gmra.mxu0 %vm265_vm0, %v238_v40 }
  0x43   : > { %2059 = vmatmul.msk.f32.gmra.mxu1 %vm265_vm0, %v238_v40  ;;  %2063 = vmatmul.msk.f32.gmra.mxu2 %vm265_vm0, %v238_v40 }
  0x44   : > { %2067 = vmatmul.msk.f32.gmra.mxu3 %vm265_vm0, %v238_v40 }
  0x46   : > { %432 = vperm.xlu2 %2333, %v2076_v63   ;;  %v2073_v63 = vld [vmem:[%s2945_s1 + $0x38] sm:$0xff] }
  0x48   : > { %606 = vperm.xlu0 %2331, %v2100_v41   ;;  %601 = vperm.xlu1 %2332, %v2099_v42  }
  0x4a   : > { %2056 = vmatmul.msk.f32.gmra.mxu0 %vm265_vm0, %v239_v43 }
  0x4b   : > { %2060 = vmatmul.msk.f32.gmra.mxu1 %vm265_vm0, %v239_v43  ;;  %2064 = vmatmul.msk.f32.gmra.mxu2 %vm265_vm0, %v239_v43 }
  0x4c   : > { %2068 = vmatmul.msk.f32.gmra.mxu3 %vm265_vm0, %v239_v43 }
  0x4e   : > { %611 = vperm.xlu2 %2333, %v2101_v0   ;;  %v2245_v0 = vld [vmem:[%s2946_s2 + $0x118] sm:$0xff] }
  0x50   : > { %785 = vperm.xlu0 %2331, %v2125_v44   ;;  %780 = vperm.xlu1 %2332, %v2124_v45  }
  0x52   : > { %2057 = vmatmul.msk.f32.gmra.mxu0 %vm265_vm0, %v240_v46 }
  0x53   : > { %2061 = vmatmul.msk.f32.gmra.mxu1 %vm265_vm0, %v240_v46  ;;  %2065 = vmatmul.msk.f32.gmra.mxu2 %vm265_vm0, %v240_v46 }
  0x54   : > { %2069 = vmatmul.msk.f32.gmra.mxu3 %vm265_vm0, %v240_v46 }
  0x56   : > { %596 = vperm.xlu2 %2333, %v2098_v3  }
  0x58   : > { %770 = vperm.xlu0 %2331, %v2122_v47   ;;  %959 = vperm.xlu1 %2332, %v2149_v48  }
  0x5e   : > { %775 = vperm.xlu2 %2333, %v2123_v9  }
  0x60   : > { %949 = vperm.xlu0 %2331, %v2147_v49   ;;  %944 = vperm.xlu1 %2332, %v2146_v50   ;;  %v2070_v49 = vld [vmem:[%s2945_s1 + $0x20] sm:$0xff] }
  0x66   : > { %954 = vperm.xlu2 %2333, %v2148_v15  }
  0x68   : > { %1128 = vperm.xlu0 %2331, %v2172_v51   ;;  %1123 = vperm.xlu1 %2332, %v2171_v52  }
  0x6e   : > { %1133 = vperm.xlu2 %2333, %v2173_v36   ;;  %v2094_v36 = vld [vmem:[%s2945_s1 + $0x40] sm:$0xff] }
  0x70   : > { %1307 = vperm.xlu0 %2331, %v2197_v53   ;;  %1302 = vperm.xlu1 %2332, %v2196_v54   ;;  %v2170_v54 = vld [vmem:[%s2946_s2 + $0xa0] sm:$0xff] }
  0x76   : > { %1118 = vperm.xlu2 %2333, %v2170_v54  }
  0x78   : > { %1292 = vperm.xlu0 %2331, %v2194_v55   ;;  %1481 = vperm.xlu1 %2332, %v2221_v56  }
  0x80   : > { %1471 = vperm.xlu0 %2331, %v2219_v57   ;;  %1466 = vperm.xlu1 %2332, %v2218_v58  }
  0x88   : > { %1650 = vperm.xlu0 %2331, %v2244_v59   ;;  %1645 = vperm.xlu1 %2332, %v2243_v60   ;;  %v2071_v59 = vld [vmem:[%s2945_s1 + $0x28] sm:$0xff] }
  0x89   : > { %v2195_v60 = vld [vmem:[%s2946_s2 + $0xc8] sm:$0xff] }
  0x8a   : > { %1297 = vperm.xlu2 %2333, %v2195_v60  }
  0x90   : > { %1814 = vperm.xlu0 %2331, %v2266_v61   ;;  %v2072_v61 = vld [vmem:[%s2945_s1 + $0x30] sm:$0xff] }
  0x92   : > { %1476 = vperm.xlu2 %2333, %v2220_v62  }
  0x9a   : > { %1655 = vperm.xlu2 %2333, %v2245_v0  }
  0xa2   : > { %v263_v8 = vpop.permute.xlu0 %262  ;;  %v253_v14 = vpop.permute.xlu1 %252 }
  0xaa   : > { %v258_v16 = vpop.permute.xlu0 %257  ;;  %v248_v27 = vpop.permute.xlu1 %247 }
  0xb7   : > { %v295_v1 = vpop.f32.mrf.mxu0 }
  0xb8   : > { %v324_v2 = vpop.f32.mrf.mxu1  ;;  %v296_v30 = vadd.f32 %v295_v1, %v248_v27  ;;  %v2242_v1 = vld [vmem:[%s2946_s2 + $0x100] sm:$0xff] }
  0xb9   : > { %v325_v31 = vadd.f32 %v324_v2, %v248_v27  ;;  %1640 = vperm.xlu2 %2333, %v2242_v1  }
  0xba   : > { %v394_v43 = vmax.f32 %v296_v30, 0.0 }
  0xbb   : > { %v395_v44 = vmax.f32 %v325_v31, 0.0 }
  0xbe   : > { %v353_v4 = vpop.f32.mrf.mxu2 }
  0xbf   : > { %v382_v5 = vpop.f32.mrf.mxu3  ;;  %v298_v6 = vpop.f32.mrf.mxu0  ;;  %v354_v50 = vadd.f32 %v353_v4, %v248_v27 }
  0xc0   : > { %v327_v7 = vpop.f32.mrf.mxu1  ;;  %v299_v19 = vadd.f32 %v298_v6, %v253_v14  ;;  %v383_v51 = vadd.f32 %v382_v5, %v248_v27  ;;  %v438_v6 = vpop.permute.xlu2 %437 }
  0xc1   : > { %v328_v20 = vadd.f32 %v327_v7, %v253_v14  ;;  %v396_v57 = vmax.f32 %v354_v50, 0.0 }
  0xc2   : > { %v398_v34 = vmax.f32 %v299_v19, 0.0  ;;  %v397_v58 = vmax.f32 %v383_v51, 0.0  ;;  %v2095_v51 = vld [vmem:[%s2945_s1 + $0x48] sm:$0xff] }
  0xc3   : > { %v399_v35 = vmax.f32 %v328_v20, 0.0 }
  0xc6   : > { %v356_v10 = vpop.f32.mrf.mxu2 }
  0xc7   : > { %v385_v11 = vpop.f32.mrf.mxu3  ;;  %v301_v12 = vpop.f32.mrf.mxu0  ;;  %v357_v45 = vadd.f32 %v356_v10, %v253_v14 }
  0xc8   : > { %v330_v13 = vpop.f32.mrf.mxu1  ;;  %v302_v23 = vadd.f32 %v301_v12, %v258_v16  ;;  %v386_v46 = vadd.f32 %v385_v11, %v253_v14 }
  0xc9   : > { %v331_v24 = vadd.f32 %v330_v13, %v258_v16  ;;  %v400_v55 = vmax.f32 %v357_v45, 0.0  ;;  %v433_v13 = vpop.permute.xlu2 %432 }
  0xca   : > { %v402_v32 = vmax.f32 %v302_v23, 0.0  ;;  %v401_v56 = vmax.f32 %v386_v46, 0.0  ;;  %v423_v23 = vpop.permute.xlu1 %422 }
  0xcb   : > { %v403_v33 = vmax.f32 %v331_v24, 0.0 }
  0xce   : > { %v359_v17 = vpop.f32.mrf.mxu2 }
  0xcf   : > { %v388_v18 = vpop.f32.mrf.mxu3  ;;  %v304_v21 = vpop.f32.mrf.mxu0  ;;  %v360_v39 = vadd.f32 %v359_v17, %v258_v16 }
  0xd0   : > { %v333_v22 = vpop.f32.mrf.mxu1  ;;  %v305_v25 = vadd.f32 %v304_v21, %v263_v8  ;;  %v389_v40 = vadd.f32 %v388_v18, %v258_v16  ;;  %v428_v18 = vpop.permute.xlu0 %427 }
  0xd1   : > { %v334_v26 = vadd.f32 %v333_v22, %v263_v8  ;;  %v404_v52 = vmax.f32 %v360_v39, 0.0  ;;  %v612_v0 = vpop.permute.xlu2 %611 }
  0xd2   : > { %v406_v28 = vmax.f32 %v305_v25, 0.0  ;;  %v405_v53 = vmax.f32 %v389_v40, 0.0 }
  0xd3   : > { %v407_v29 = vmax.f32 %v334_v26, 0.0 }
  0xd4   : > { %464 = vmatpush.msrb.mxu0 %v406_v28 }
  0xd5   : > { %493 = vmatpush.msrb.mxu1 %v407_v29 }
  0xd6   : > { %v362_v37 = vpop.f32.mrf.mxu2  ;;  %465 = vmatpush.msrb.mxu0 %v402_v32 }
  0xd7   : > { %v391_v38 = vpop.f32.mrf.mxu3  ;;  %494 = vmatpush.msrb.mxu1 %v403_v33  ;;  %v363_v41 = vadd.f32 %v362_v37, %v263_v8 }
  0xd8   : > { %v392_v42 = vadd.f32 %v391_v38, %v263_v8  ;;  %466 = vmatpush.msrb.mxu0 %v398_v34 }
  0xd9   : > { %495 = vmatpush.msrb.mxu1 %v399_v35  ;;  %v408_v47 = vmax.f32 %v363_v41, 0.0 }
  0xda   : > { %v409_v48 = vmax.f32 %v392_v42, 0.0  ;;  %467 = vmatpush.msrb.mxu0 %v394_v43 }
  0xdb   : > { %496 = vmatpush.msrb.mxu1 %v395_v44  ;;  %522 = vmatpush.msrb.mxu2 %v408_v47 }
  0xdc   : > { %551 = vmatpush.msrb.mxu3 %v409_v48  ;;  %2078 = vmatmul.msk.f32.vlgmr.msrb.gmra.mxu0 %vm265_vm0, %v2070_v49 }
  0xdd   : > { %2082 = vmatmul.msk.f32.vlgmr.msrb.gmra.mxu1 %vm265_vm0, %v2070_v49  ;;  %523 = vmatpush.msrb.mxu2 %v404_v52 }
  0xde   : > { %552 = vmatpush.msrb.mxu3 %v405_v53 }
  0xdf   : > { %524 = vmatpush.msrb.mxu2 %v400_v55 }
  0xe0   : > { %553 = vmatpush.msrb.mxu3 %v401_v56  ;;  %v2096_v56 = vld [vmem:[%s2945_s1 + $0x50] sm:$0xff] }
  0xe1   : > { %525 = vmatpush.msrb.mxu2 %v396_v57  ;;  %v2097_v57 = vld [vmem:[%s2945_s1 + $0x58] sm:$0xff] }
  0xe2   : > { %554 = vmatpush.msrb.mxu3 %v397_v58  ;;  %2086 = vmatmul.msk.f32.vlgmr.msrb.gmra.mxu2 %vm265_vm0, %v2070_v49 }
  0xe3   : > { %2090 = vmatmul.msk.f32.vlgmr.msrb.gmra.mxu3 %vm265_vm0, %v2070_v49 }
  0xe4   : > { %2079 = vmatmul.msk.f32.gmra.mxu0 %vm265_vm0, %v2071_v59 }
  0xe5   : > { %2083 = vmatmul.msk.f32.gmra.mxu1 %vm265_vm0, %v2071_v59 }
  0xea   : > { %2087 = vmatmul.msk.f32.gmra.mxu2 %vm265_vm0, %v2071_v59 }
  0xeb   : > { %2091 = vmatmul.msk.f32.gmra.mxu3 %vm265_vm0, %v2071_v59 }
  0xec   : > { %2080 = vmatmul.msk.f32.gmra.mxu0 %vm265_vm0, %v2072_v61 }
  0xed   : > { %2084 = vmatmul.msk.f32.gmra.mxu1 %vm265_vm0, %v2072_v61 }
  0xf2   : > { %2088 = vmatmul.msk.f32.gmra.mxu2 %vm265_vm0, %v2072_v61 }
  0xf3   : > { %2092 = vmatmul.msk.f32.gmra.mxu3 %vm265_vm0, %v2072_v61 }
  0xf4   : > { %2081 = vmatmul.msk.f32.gmra.mxu0 %vm265_vm0, %v2073_v63 }
  0xf5   : > { %2085 = vmatmul.msk.f32.gmra.mxu1 %vm265_vm0, %v2073_v63 }
  0xfa   : > { %2089 = vmatmul.msk.f32.gmra.mxu2 %vm265_vm0, %v2073_v63 }
  0xfb   : > { %2093 = vmatmul.msk.f32.gmra.mxu3 %vm265_vm0, %v2073_v63 }
 0x159   : > { %v469_v2 = vpop.f32.mrf.mxu0 }
 0x15a   : > { %v498_v3 = vpop.f32.mrf.mxu1  ;;  %v470_v30 = vadd.f32 %v469_v2, %v423_v23 }
 0x15b   : > { %v499_v31 = vadd.f32 %v498_v3, %v423_v23  ;;  %v607_v3 = vpop.permute.xlu0 %606 }
 0x15c   : > { %v568_v34 = vmax.f32 %v470_v30, 0.0 }
 0x15d   : > { %v569_v35 = vmax.f32 %v499_v31, 0.0 }
 0x161   : > { %v472_v4 = vpop.f32.mrf.mxu0 }
 0x162   : > { %v501_v5 = vpop.f32.mrf.mxu1  ;;  %v473_v21 = vadd.f32 %v472_v4, %v428_v18 }
 0x163   : > { %v502_v22 = vadd.f32 %v501_v5, %v428_v18 }
 0x164   : > { %v572_v32 = vmax.f32 %v473_v21, 0.0 }
 0x165   : > { %v527_v7 = vpop.f32.mrf.mxu2  ;;  %v573_v33 = vmax.f32 %v502_v22, 0.0 }
 0x166   : > { %v556_v8 = vpop.f32.mrf.mxu3  ;;  %v528_v47 = vadd.f32 %v527_v7, %v423_v23 }
 0x167   : > { %v557_v48 = vadd.f32 %v556_v8, %v423_v23 }
 0x168   : > { %v570_v54 = vmax.f32 %v528_v47, 0.0 }
 0x169   : > { %v475_v9 = vpop.f32.mrf.mxu0  ;;  %v571_v55 = vmax.f32 %v557_v48, 0.0 }
 0x16a   : > { %v504_v10 = vpop.f32.mrf.mxu1  ;;  %v476_v14 = vadd.f32 %v475_v9, %v433_v13 }
 0x16b   : > { %v505_v15 = vadd.f32 %v504_v10, %v433_v13 }
 0x16c   : > { %v576_v24 = vmax.f32 %v476_v14, 0.0 }
 0x16d   : > { %v530_v11 = vpop.f32.mrf.mxu2  ;;  %v577_v25 = vmax.f32 %v505_v15, 0.0 }
 0x16e   : > { %v559_v12 = vpop.f32.mrf.mxu3  ;;  %v531_v43 = vadd.f32 %v530_v11, %v428_v18 }
 0x16f   : > { %v560_v44 = vadd.f32 %v559_v12, %v428_v18 }
 0x170   : > { %v574_v52 = vmax.f32 %v531_v43, 0.0 }
 0x171   : > { %v478_v16 = vpop.f32.mrf.mxu0  ;;  %v575_v53 = vmax.f32 %v560_v44, 0.0 }
 0x172   : > { %v507_v17 = vpop.f32.mrf.mxu1  ;;  %v479_v19 = vadd.f32 %v478_v16, %v438_v6 }
 0x173   : > { %v508_v20 = vadd.f32 %v507_v17, %v438_v6  ;;  %v597_v17 = vpop.permute.xlu2 %596 }
 0x174   : > { %v580_v26 = vmax.f32 %v479_v19, 0.0 }
 0x175   : > { %v581_v27 = vmax.f32 %v508_v20, 0.0  ;;  %v533_v28 = vpop.f32.mrf.mxu2 }
 0x176   : > { %v562_v29 = vpop.f32.mrf.mxu3  ;;  %638 = vmatpush.msra.mxu0 %v580_v26  ;;  %v534_v39 = vadd.f32 %v533_v28, %v433_v13  ;;  %v2118_v26 = vld [vmem:[%s2945_s1 + $0x60] sm:$0xff] }
 0x177   : > { %667 = vmatpush.msra.mxu1 %v581_v27  ;;  %v563_v40 = vadd.f32 %v562_v29, %v433_v13  ;;  %v2119_v29 = vld [vmem:[%s2945_s1 + $0x68] sm:$0xff] }
 0x178   : > { %639 = vmatpush.msra.mxu0 %v576_v24  ;;  %v578_v49 = vmax.f32 %v534_v39, 0.0 }
 0x179   : > { %668 = vmatpush.msra.mxu1 %v577_v25  ;;  %v579_v50 = vmax.f32 %v563_v40, 0.0 }
 0x17a   : > { %640 = vmatpush.msra.mxu0 %v572_v32 }
 0x17b   : > { %669 = vmatpush.msra.mxu1 %v573_v33 }
 0x17c   : > { %641 = vmatpush.msra.mxu0 %v568_v34 }
 0x17d   : > { %670 = vmatpush.msra.mxu1 %v569_v35  ;;  %v536_v37 = vpop.f32.mrf.mxu2  ;;  %2102 = vmatmul.msk.f32.vlgmr.msra.gmra.mxu0 %vm265_vm0, %v2094_v36 }
 0x17e   : > { %v565_v38 = vpop.f32.mrf.mxu3  ;;  %2106 = vmatmul.msk.f32.vlgmr.msra.gmra.mxu1 %vm265_vm0, %v2094_v36  ;;  %v537_v41 = vadd.f32 %v536_v37, %v438_v6 }
 0x17f   : > { %v566_v42 = vadd.f32 %v565_v38, %v438_v6  ;;  %v602_v6 = vpop.permute.xlu1 %601 }
 0x180   : > { %v582_v45 = vmax.f32 %v537_v41, 0.0 }
 0x181   : > { %v583_v46 = vmax.f32 %v566_v42, 0.0 }
 0x182   : > { %696 = vmatpush.msra.mxu2 %v582_v45 }
 0x183   : > { %725 = vmatpush.msra.mxu3 %v583_v46  ;;  %v2120_v46 = vld [vmem:[%s2945_s1 + $0x70] sm:$0xff] }
 0x184   : > { %697 = vmatpush.msra.mxu2 %v578_v49  ;;  %v2121_v49 = vld [vmem:[%s2945_s1 + $0x78] sm:$0xff] }
 0x185   : > { %726 = vmatpush.msra.mxu3 %v579_v50  ;;  %2103 = vmatmul.msk.f32.gmra.mxu0 %vm265_vm0, %v2095_v51 }
 0x186   : > { %2107 = vmatmul.msk.f32.gmra.mxu1 %vm265_vm0, %v2095_v51  ;;  %698 = vmatpush.msra.mxu2 %v574_v52 }
 0x187   : > { %727 = vmatpush.msra.mxu3 %v575_v53 }
 0x188   : > { %699 = vmatpush.msra.mxu2 %v570_v54 }
 0x189   : > { %728 = vmatpush.msra.mxu3 %v571_v55  ;;  %2110 = vmatmul.msk.f32.vlgmr.msra.gmra.mxu2 %vm265_vm0, %v2094_v36 }
 0x18a   : > { %2114 = vmatmul.msk.f32.vlgmr.msra.gmra.mxu3 %vm265_vm0, %v2094_v36 }
 0x18d   : > { %2104 = vmatmul.msk.f32.gmra.mxu0 %vm265_vm0, %v2096_v56 }
 0x18e   : > { %2108 = vmatmul.msk.f32.gmra.mxu1 %vm265_vm0, %v2096_v56 }
 0x191   : > { %2111 = vmatmul.msk.f32.gmra.mxu2 %vm265_vm0, %v2095_v51 }
 0x192   : > { %2115 = vmatmul.msk.f32.gmra.mxu3 %vm265_vm0, %v2095_v51 }
 0x195   : > { %2105 = vmatmul.msk.f32.gmra.mxu0 %vm265_vm0, %v2097_v57 }
 0x196   : > { %2109 = vmatmul.msk.f32.gmra.mxu1 %vm265_vm0, %v2097_v57 }
 0x199   : > { %2112 = vmatmul.msk.f32.gmra.mxu2 %vm265_vm0, %v2096_v56 }
 0x19a   : > { %2116 = vmatmul.msk.f32.gmra.mxu3 %vm265_vm0, %v2096_v56  ;;  %v786_v56 = vpop.permute.xlu0 %785 }
 0x1a1   : > { %2113 = vmatmul.msk.f32.gmra.mxu2 %vm265_vm0, %v2097_v57 }
 0x1a2   : > { %2117 = vmatmul.msk.f32.gmra.mxu3 %vm265_vm0, %v2097_v57  ;;  %v781_v57 = vpop.permute.xlu1 %780 }
 0x1fa   : > { %v643_v58 = vpop.f32.mrf.mxu0 }
 0x1fb   : > { %v672_v59 = vpop.f32.mrf.mxu1  ;;  %v644_v18 = vadd.f32 %v643_v58, %v597_v17 }
 0x1fc   : > { %v673_v19 = vadd.f32 %v672_v59, %v597_v17 }
 0x1fd   : > { %v742_v24 = vmax.f32 %v644_v18, 0.0  ;;  %v2142_v18 = vld [vmem:[%s2945_s1 + $0x80] sm:$0xff] }
 0x1fe   : > { %v743_v25 = vmax.f32 %v673_v19, 0.0 }
 0x202   : > { %v646_v60 = vpop.f32.mrf.mxu0 }
 0x203   : > { %v675_v61 = vpop.f32.mrf.mxu1  ;;  %v647_v13 = vadd.f32 %v646_v60, %v602_v6 }
 0x204   : > { %v676_v14 = vadd.f32 %v675_v61, %v602_v6 }
 0x205   : > { %v746_v22 = vmax.f32 %v647_v13, 0.0 }
 0x206   : > { %v747_v23 = vmax.f32 %v676_v14, 0.0 }
 0x20a   : > { %v649_v62 = vpop.f32.mrf.mxu0 }
 0x20b   : > { %v678_v63 = vpop.f32.mrf.mxu1  ;;  %v650_v7 = vadd.f32 %v649_v62, %v607_v3 }
 0x20c   : > { %v701_v1 = vpop.f32.mrf.mxu2  ;;  %v679_v8 = vadd.f32 %v678_v63, %v607_v3 }
 0x20d   : > { %v730_v2 = vpop.f32.mrf.mxu3  ;;  %v750_v20 = vmax.f32 %v650_v7, 0.0  ;;  %v702_v40 = vadd.f32 %v701_v1, %v597_v17  ;;  %v771_v7 = vpop.permute.xlu0 %770 }
 0x20e   : > { %v751_v21 = vmax.f32 %v679_v8, 0.0  ;;  %v731_v41 = vadd.f32 %v730_v2, %v597_v17  ;;  %v776_v2 = vpop.permute.xlu2 %775 }
 0x20f   : > { %v744_v47 = vmax.f32 %v702_v40, 0.0 }
 0x210   : > { %v745_v48 = vmax.f32 %v731_v41, 0.0  ;;  %v2145_v41 = vld [vmem:[%s2945_s1 + $0x98] sm:$0xff] }
 0x212   : > { %v652_v4 = vpop.f32.mrf.mxu0 }
 0x213   : > { %v681_v5 = vpop.f32.mrf.mxu1  ;;  %v653_v9 = vadd.f32 %v652_v4, %v612_v0 }
 0x214   : > { %v682_v10 = vadd.f32 %v681_v5, %v612_v0  ;;  %v704_v11 = vpop.f32.mrf.mxu2 }
 0x215   : > { %v733_v12 = vpop.f32.mrf.mxu3  ;;  %v754_v15 = vmax.f32 %v653_v9, 0.0  ;;  %v705_v36 = vadd.f32 %v704_v11, %v602_v6 }
 0x216   : > { %v755_v16 = vmax.f32 %v682_v10, 0.0  ;;  %v734_v37 = vadd.f32 %v733_v12, %v602_v6 }
 0x217   : > { %812 = vmatpush.msrb.mxu0 %v754_v15  ;;  %v748_v44 = vmax.f32 %v705_v36, 0.0 }
 0x218   : > { %841 = vmatpush.msrb.mxu1 %v755_v16  ;;  %v749_v45 = vmax.f32 %v734_v37, 0.0 }
 0x219   : > { %813 = vmatpush.msrb.mxu0 %v750_v20 }
 0x21a   : > { %842 = vmatpush.msrb.mxu1 %v751_v21  ;;  %v2143_v21 = vld [vmem:[%s2945_s1 + $0x88] sm:$0xff] }
 0x21b   : > { %814 = vmatpush.msrb.mxu0 %v746_v22 }
 0x21c   : > { %843 = vmatpush.msrb.mxu1 %v747_v23  ;;  %v707_v27 = vpop.f32.mrf.mxu2 }
 0x21d   : > { %v736_v28 = vpop.f32.mrf.mxu3  ;;  %815 = vmatpush.msrb.mxu0 %v742_v24  ;;  %v708_v32 = vadd.f32 %v707_v27, %v607_v3  ;;  %v2144_v24 = vld [vmem:[%s2945_s1 + $0x90] sm:$0xff] }
 0x21e   : > { %844 = vmatpush.msrb.mxu1 %v743_v25  ;;  %2126 = vmatmul.msk.f32.vlgmr.msrb.gmra.mxu0 %vm265_vm0, %v2118_v26  ;;  %v737_v33 = vadd.f32 %v736_v28, %v607_v3 }
 0x21f   : > { %2130 = vmatmul.msk.f32.vlgmr.msrb.gmra.mxu1 %vm265_vm0, %v2118_v26  ;;  %v752_v42 = vmax.f32 %v708_v32, 0.0 }
 0x220   : > { %v753_v43 = vmax.f32 %v737_v33, 0.0 }
 0x224   : > { %v710_v30 = vpop.f32.mrf.mxu2 }
 0x225   : > { %v739_v31 = vpop.f32.mrf.mxu3  ;;  %v711_v34 = vadd.f32 %v710_v30, %v612_v0 }
 0x226   : > { %v740_v35 = vadd.f32 %v739_v31, %v612_v0  ;;  %2127 = vmatmul.msk.f32.gmra.mxu0 %vm265_vm0, %v2119_v29 }
 0x227   : > { %2131 = vmatmul.msk.f32.gmra.mxu1 %vm265_vm0, %v2119_v29  ;;  %v756_v38 = vmax.f32 %v711_v34, 0.0 }
 0x228   : > { %v757_v39 = vmax.f32 %v740_v35, 0.0 }
 0x229   : > { %870 = vmatpush.msrb.mxu2 %v756_v38 }
 0x22a   : > { %899 = vmatpush.msrb.mxu3 %v757_v39 }
 0x22b   : > { %871 = vmatpush.msrb.mxu2 %v752_v42 }
 0x22c   : > { %900 = vmatpush.msrb.mxu3 %v753_v43 }
 0x22d   : > { %872 = vmatpush.msrb.mxu2 %v748_v44 }
 0x22e   : > { %901 = vmatpush.msrb.mxu3 %v749_v45  ;;  %2128 = vmatmul.msk.f32.gmra.mxu0 %vm265_vm0, %v2120_v46 }
 0x22f   : > { %2132 = vmatmul.msk.f32.gmra.mxu1 %vm265_vm0, %v2120_v46  ;;  %873 = vmatpush.msrb.mxu2 %v744_v47 }
 0x230   : > { %902 = vmatpush.msrb.mxu3 %v745_v48  ;;  %2134 = vmatmul.msk.f32.vlgmr.msrb.gmra.mxu2 %vm265_vm0, %v2118_v26  ;;  %v960_v48 = vpop.permute.xlu1 %959 }
 0x231   : > { %2138 = vmatmul.msk.f32.vlgmr.msrb.gmra.mxu3 %vm265_vm0, %v2118_v26 }
 0x236   : > { %2129 = vmatmul.msk.f32.gmra.mxu0 %vm265_vm0, %v2121_v49 }
 0x237   : > { %2133 = vmatmul.msk.f32.gmra.mxu1 %vm265_vm0, %v2121_v49 }
 0x238   : > { %2135 = vmatmul.msk.f32.gmra.mxu2 %vm265_vm0, %v2119_v29 }
 0x239   : > { %2139 = vmatmul.msk.f32.gmra.mxu3 %vm265_vm0, %v2119_v29 }
 0x240   : > { %2136 = vmatmul.msk.f32.gmra.mxu2 %vm265_vm0, %v2120_v46 }
 0x241   : > { %2140 = vmatmul.msk.f32.gmra.mxu3 %vm265_vm0, %v2120_v46 }
 0x248   : > { %2137 = vmatmul.msk.f32.gmra.mxu2 %vm265_vm0, %v2121_v49 }
 0x249   : > { %2141 = vmatmul.msk.f32.gmra.mxu3 %vm265_vm0, %v2121_v49  ;;  %v955_v49 = vpop.permute.xlu2 %954 }
 0x29b   : > { %v817_v50 = vpop.f32.mrf.mxu0 }
 0x29c   : > { %v846_v51 = vpop.f32.mrf.mxu1  ;;  %v818_v8 = vadd.f32 %v817_v50, %v771_v7 }
 0x29d   : > { %v847_v9 = vadd.f32 %v846_v51, %v771_v7 }
 0x29e   : > { %v916_v14 = vmax.f32 %v818_v8, 0.0  ;;  %v2166_v8 = vld [vmem:[%s2945_s1 + $0xa0] sm:$0xff] }
 0x29f   : > { %v917_v15 = vmax.f32 %v847_v9, 0.0 }
 0x2a3   : > { %v820_v52 = vpop.f32.mrf.mxu0 }
 0x2a4   : > { %v849_v53 = vpop.f32.mrf.mxu1  ;;  %v821_v3 = vadd.f32 %v820_v52, %v776_v2 }
 0x2a5   : > { %v850_v4 = vadd.f32 %v849_v53, %v776_v2 }
 0x2a6   : > { %v920_v12 = vmax.f32 %v821_v3, 0.0 }
 0x2a7   : > { %v921_v13 = vmax.f32 %v850_v4, 0.0 }
 0x2ab   : > { %v823_v54 = vpop.f32.mrf.mxu0 }
 0x2ac   : > { %v852_v55 = vpop.f32.mrf.mxu1  ;;  %v824_v60 = vadd.f32 %v823_v54, %v781_v57 }
 0x2ad   : > { %v853_v61 = vadd.f32 %v852_v55, %v781_v57 }
 0x2ae   : > { %v924_v10 = vmax.f32 %v824_v60, 0.0 }
 0x2af   : > { %v925_v11 = vmax.f32 %v853_v61, 0.0  ;;  %v945_v61 = vpop.permute.xlu1 %944 }
 0x2b3   : > { %v826_v58 = vpop.f32.mrf.mxu0  ;;  %v875_v0 = vpop.f32.mrf.mxu2 }
 0x2b4   : > { %v855_v59 = vpop.f32.mrf.mxu1  ;;  %v827_v62 = vadd.f32 %v826_v58, %v786_v56  ;;  %v904_v1 = vpop.f32.mrf.mxu3  ;;  %v876_v33 = vadd.f32 %v875_v0, %v771_v7 }
 0x2b5   : > { %v856_v63 = vadd.f32 %v855_v59, %v786_v56  ;;  %v905_v34 = vadd.f32 %v904_v1, %v771_v7 }
 0x2b6   : > { %v928_v5 = vmax.f32 %v827_v62, 0.0  ;;  %v918_v39 = vmax.f32 %v876_v33, 0.0 }
 0x2b7   : > { %v929_v6 = vmax.f32 %v856_v63, 0.0  ;;  %v919_v40 = vmax.f32 %v905_v34, 0.0 }
 0x2b8   : > { %986 = vmatpush.msra.mxu0 %v928_v5 }
 0x2b9   : > { %1015 = vmatpush.msra.mxu1 %v929_v6 }
 0x2ba   : > { %987 = vmatpush.msra.mxu0 %v924_v10 }
 0x2bb   : > { %1016 = vmatpush.msra.mxu1 %v925_v11  ;;  %v878_v16 = vpop.f32.mrf.mxu2  ;;  %v2167_v11 = vld [vmem:[%s2945_s1 + $0xa8] sm:$0xff] }
 0x2bc   : > { %v907_v17 = vpop.f32.mrf.mxu3  ;;  %988 = vmatpush.msra.mxu0 %v920_v12  ;;  %v879_v29 = vadd.f32 %v878_v16, %v776_v2 }
 0x2bd   : > { %1017 = vmatpush.msra.mxu1 %v921_v13  ;;  %v908_v30 = vadd.f32 %v907_v17, %v776_v2 }
 0x2be   : > { %989 = vmatpush.msra.mxu0 %v916_v14  ;;  %v922_v37 = vmax.f32 %v879_v29, 0.0  ;;  %v2168_v14 = vld [vmem:[%s2945_s1 + $0xb0] sm:$0xff] }
 0x2bf   : > { %1018 = vmatpush.msra.mxu1 %v917_v15  ;;  %2150 = vmatmul.msk.f32.vlgmr.msra.gmra.mxu0 %vm265_vm0, %v2142_v18  ;;  %v923_v38 = vmax.f32 %v908_v30, 0.0 }
 0x2c0   : > { %2154 = vmatmul.msk.f32.vlgmr.msra.gmra.mxu1 %vm265_vm0, %v2142_v18 }
 0x2c3   : > { %v881_v19 = vpop.f32.mrf.mxu2 }
 0x2c4   : > { %v910_v20 = vpop.f32.mrf.mxu3  ;;  %v882_v25 = vadd.f32 %v881_v19, %v781_v57 }
 0x2c5   : > { %v911_v26 = vadd.f32 %v910_v20, %v781_v57 }
 0x2c6   : > { %v926_v35 = vmax.f32 %v882_v25, 0.0  ;;  %v2169_v25 = vld [vmem:[%s2945_s1 + $0xb8] sm:$0xff] }
 0x2c7   : > { %2151 = vmatmul.msk.f32.gmra.mxu0 %vm265_vm0, %v2143_v21  ;;  %v927_v36 = vmax.f32 %v911_v26, 0.0 }
 0x2c8   : > { %2155 = vmatmul.msk.f32.gmra.mxu1 %vm265_vm0, %v2143_v21 }
 0x2cb   : > { %v884_v22 = vpop.f32.mrf.mxu2 }
 0x2cc   : > { %v913_v23 = vpop.f32.mrf.mxu3  ;;  %v885_v27 = vadd.f32 %v884_v22, %v786_v56 }
 0x2cd   : > { %v914_v28 = vadd.f32 %v913_v23, %v786_v56  ;;  %v950_v56 = vpop.permute.xlu0 %949 }
 0x2ce   : > { %v930_v31 = vmax.f32 %v885_v27, 0.0 }
 0x2cf   : > { %v931_v32 = vmax.f32 %v914_v28, 0.0  ;;  %2152 = vmatmul.msk.f32.gmra.mxu0 %vm265_vm0, %v2144_v24 }
 0x2d0   : > { %2156 = vmatmul.msk.f32.gmra.mxu1 %vm265_vm0, %v2144_v24  ;;  %1044 = vmatpush.msra.mxu2 %v930_v31 }
 0x2d1   : > { %1073 = vmatpush.msra.mxu3 %v931_v32 }
 0x2d2   : > { %1045 = vmatpush.msra.mxu2 %v926_v35 }
 0x2d3   : > { %1074 = vmatpush.msra.mxu3 %v927_v36 }
 0x2d4   : > { %1046 = vmatpush.msra.mxu2 %v922_v37 }
 0x2d5   : > { %1075 = vmatpush.msra.mxu3 %v923_v38 }
 0x2d6   : > { %1047 = vmatpush.msra.mxu2 %v918_v39 }
 0x2d7   : > { %1076 = vmatpush.msra.mxu3 %v919_v40  ;;  %2153 = vmatmul.msk.f32.gmra.mxu0 %vm265_vm0, %v2145_v41  ;;  %v1134_v40 = vpop.permute.xlu2 %1133 }
 0x2d8   : > { %2157 = vmatmul.msk.f32.gmra.mxu1 %vm265_vm0, %v2145_v41  ;;  %2158 = vmatmul.msk.f32.vlgmr.msra.gmra.mxu2 %vm265_vm0, %v2142_v18 }
 0x2d9   : > { %2162 = vmatmul.msk.f32.vlgmr.msra.gmra.mxu3 %vm265_vm0, %v2142_v18 }
 0x2e0   : > { %2159 = vmatmul.msk.f32.gmra.mxu2 %vm265_vm0, %v2143_v21 }
 0x2e1   : > { %2163 = vmatmul.msk.f32.gmra.mxu3 %vm265_vm0, %v2143_v21 }
 0x2e8   : > { %2160 = vmatmul.msk.f32.gmra.mxu2 %vm265_vm0, %v2144_v24 }
 0x2e9   : > { %2164 = vmatmul.msk.f32.gmra.mxu3 %vm265_vm0, %v2144_v24 }
 0x2f0   : > { %2161 = vmatmul.msk.f32.gmra.mxu2 %vm265_vm0, %v2145_v41 }
 0x2f1   : > { %2165 = vmatmul.msk.f32.gmra.mxu3 %vm265_vm0, %v2145_v41  ;;  %v1129_v41 = vpop.permute.xlu0 %1128 }
 0x33c   : > { %v991_v42 = vpop.f32.mrf.mxu0 }
 0x33d   : > { %v1020_v43 = vpop.f32.mrf.mxu1  ;;  %v992_v62 = vadd.f32 %v991_v42, %v945_v61 }
 0x33e   : > { %v1021_v63 = vadd.f32 %v1020_v43, %v945_v61 }
 0x33f   : > { %v1090_v6 = vmax.f32 %v992_v62, 0.0  ;;  %v2190_v62 = vld [vmem:[%s2945_s1 + $0xc0] sm:$0xff] }
 0x340   : > { %v1091_v7 = vmax.f32 %v1021_v63, 0.0 }
 0x344   : > { %v994_v44 = vpop.f32.mrf.mxu0 }
 0x345   : > { %v1023_v45 = vpop.f32.mrf.mxu1  ;;  %v995_v57 = vadd.f32 %v994_v44, %v950_v56 }
 0x346   : > { %v1024_v58 = vadd.f32 %v1023_v45, %v950_v56 }
 0x347   : > { %v1094_v2 = vmax.f32 %v995_v57, 0.0 }
 0x348   : > { %v1095_v3 = vmax.f32 %v1024_v58, 0.0 }
 0x34c   : > { %v997_v46 = vpop.f32.mrf.mxu0 }
 0x34d   : > { %v1026_v47 = vpop.f32.mrf.mxu1  ;;  %v998_v52 = vadd.f32 %v997_v46, %v955_v49 }
 0x34e   : > { %v1027_v53 = vadd.f32 %v1026_v47, %v955_v49 }
 0x34f   : > { %v1098_v0 = vmax.f32 %v998_v52, 0.0 }
 0x350   : > { %v1099_v1 = vmax.f32 %v1027_v53, 0.0  ;;  %v1119_v53 = vpop.permute.xlu2 %1118 }
 0x354   : > { %v1000_v50 = vpop.f32.mrf.mxu0 }
 0x355   : > { %v1029_v51 = vpop.f32.mrf.mxu1  ;;  %v1001_v54 = vadd.f32 %v1000_v50, %v960_v48 }
 0x356   : > { %v1030_v55 = vadd.f32 %v1029_v51, %v960_v48 }
 0x357   : > { %v1102_v59 = vmax.f32 %v1001_v54, 0.0 }
 0x358   : > { %v1103_v60 = vmax.f32 %v1030_v55, 0.0 }
 0x359   : > { %1160 = vmatpush.msrb.mxu0 %v1102_v59 }
 0x35a   : > { %1189 = vmatpush.msrb.mxu1 %v1103_v60 }
 0x35b   : > { %v1049_v4 = vpop.f32.mrf.mxu2  ;;  %1161 = vmatpush.msrb.mxu0 %v1098_v0 }
 0x35c   : > { %v1078_v5 = vpop.f32.mrf.mxu3  ;;  %1190 = vmatpush.msrb.mxu1 %v1099_v1  ;;  %v1050_v26 = vadd.f32 %v1049_v4, %v945_v61  ;;  %v2191_v1 = vld [vmem:[%s2945_s1 + $0xc8] sm:$0xff]  ;;  %v2192_v4 = vld [vmem:[%s2945_s1 + $0xd0] sm:$0xff] }
 0x35d   : > { %1162 = vmatpush.msrb.mxu0 %v1094_v2  ;;  %v1079_v27 = vadd.f32 %v1078_v5, %v945_v61 }
 0x35e   : > { %1191 = vmatpush.msrb.mxu1 %v1095_v3  ;;  %v1092_v32 = vmax.f32 %v1050_v26, 0.0 }
 0x35f   : > { %1163 = vmatpush.msrb.mxu0 %v1090_v6  ;;  %v1093_v33 = vmax.f32 %v1079_v27, 0.0 }
 0x360   : > { %1192 = vmatpush.msrb.mxu1 %v1091_v7  ;;  %2174 = vmatmul.msk.f32.vlgmr.msrb.gmra.mxu0 %vm265_vm0, %v2166_v8  ;;  %v2193_v7 = vld [vmem:[%s2945_s1 + $0xd8] sm:$0xff] }
 0x361   : > { %2178 = vmatmul.msk.f32.vlgmr.msrb.gmra.mxu1 %vm265_vm0, %v2166_v8 }
 0x363   : > { %v1052_v9 = vpop.f32.mrf.mxu2 }
 0x364   : > { %v1081_v10 = vpop.f32.mrf.mxu3  ;;  %v1053_v21 = vadd.f32 %v1052_v9, %v950_v56 }
 0x365   : > { %v1082_v22 = vadd.f32 %v1081_v10, %v950_v56 }
 0x366   : > { %v1096_v30 = vmax.f32 %v1053_v21, 0.0 }
 0x367   : > { %v1097_v31 = vmax.f32 %v1082_v22, 0.0 }
 0x368   : > { %2175 = vmatmul.msk.f32.gmra.mxu0 %vm265_vm0, %v2167_v11 }
 0x369   : > { %2179 = vmatmul.msk.f32.gmra.mxu1 %vm265_vm0, %v2167_v11 }
 0x36b   : > { %v1055_v12 = vpop.f32.mrf.mxu2 }
 0x36c   : > { %v1084_v13 = vpop.f32.mrf.mxu3  ;;  %v1056_v17 = vadd.f32 %v1055_v12, %v955_v49 }
 0x36d   : > { %v1085_v18 = vadd.f32 %v1084_v13, %v955_v49 }
 0x36e   : > { %v1100_v28 = vmax.f32 %v1056_v17, 0.0 }
 0x36f   : > { %v1101_v29 = vmax.f32 %v1085_v18, 0.0 }
 0x370   : > { %2176 = vmatmul.msk.f32.gmra.mxu0 %vm265_vm0, %v2168_v14 }
 0x371   : > { %2180 = vmatmul.msk.f32.gmra.mxu1 %vm265_vm0, %v2168_v14 }
 0x373   : > { %v1058_v15 = vpop.f32.mrf.mxu2 }
 0x374   : > { %v1087_v16 = vpop.f32.mrf.mxu3  ;;  %v1059_v19 = vadd.f32 %v1058_v15, %v960_v48 }
 0x375   : > { %v1088_v20 = vadd.f32 %v1087_v16, %v960_v48  ;;  %v1124_v48 = vpop.permute.xlu1 %1123 }
 0x376   : > { %v1104_v23 = vmax.f32 %v1059_v19, 0.0 }
 0x377   : > { %v1105_v24 = vmax.f32 %v1088_v20, 0.0 }
 0x378   : > { %1218 = vmatpush.msrb.mxu2 %v1104_v23  ;;  %2177 = vmatmul.msk.f32.gmra.mxu0 %vm265_vm0, %v2169_v25 }
 0x379   : > { %1247 = vmatpush.msrb.mxu3 %v1105_v24  ;;  %2181 = vmatmul.msk.f32.gmra.mxu1 %vm265_vm0, %v2169_v25 }
 0x37a   : > { %1219 = vmatpush.msrb.mxu2 %v1100_v28 }
 0x37b   : > { %1248 = vmatpush.msrb.mxu3 %v1101_v29 }
 0x37c   : > { %1220 = vmatpush.msrb.mxu2 %v1096_v30 }
 0x37d   : > { %1249 = vmatpush.msrb.mxu3 %v1097_v31 }
 0x37e   : > { %1221 = vmatpush.msrb.mxu2 %v1092_v32  ;;  %v1308_v32 = vpop.permute.xlu0 %1307 }
 0x37f   : > { %1250 = vmatpush.msrb.mxu3 %v1093_v33  ;;  %2182 = vmatmul.msk.f32.vlgmr.msrb.gmra.mxu2 %vm265_vm0, %v2166_v8  ;;  %v1303_v33 = vpop.permute.xlu1 %1302 }
 0x380   : > { %2186 = vmatmul.msk.f32.vlgmr.msrb.gmra.mxu3 %vm265_vm0, %v2166_v8 }
 0x387   : > { %2183 = vmatmul.msk.f32.gmra.mxu2 %vm265_vm0, %v2167_v11 }
 0x388   : > { %2187 = vmatmul.msk.f32.gmra.mxu3 %vm265_vm0, %v2167_v11 }
 0x38f   : > { %2184 = vmatmul.msk.f32.gmra.mxu2 %vm265_vm0, %v2168_v14 }
 0x390   : > { %2188 = vmatmul.msk.f32.gmra.mxu3 %vm265_vm0, %v2168_v14 }
 0x397   : > { %2185 = vmatmul.msk.f32.gmra.mxu2 %vm265_vm0, %v2169_v25 }
 0x398   : > { %2189 = vmatmul.msk.f32.gmra.mxu3 %vm265_vm0, %v2169_v25 }
 0x3dd   : > { %v1165_v34 = vpop.f32.mrf.mxu0 }
 0x3de   : > { %v1194_v35 = vpop.f32.mrf.mxu1  ;;  %v1166_v54 = vadd.f32 %v1165_v34, %v1119_v53 }
 0x3df   : > { %v1195_v55 = vadd.f32 %v1194_v35, %v1119_v53 }
 0x3e0   : > { %v1264_v60 = vmax.f32 %v1166_v54, 0.0  ;;  %v2214_v54 = vld [vmem:[%s2945_s1 + $0xe0] sm:$0xff] }
 0x3e1   : > { %v1265_v61 = vmax.f32 %v1195_v55, 0.0  ;;  %v2215_v55 = vld [vmem:[%s2945_s1 + $0xe8] sm:$0xff] }
 0x3e5   : > { %v1168_v36 = vpop.f32.mrf.mxu0 }
 0x3e6   : > { %v1197_v37 = vpop.f32.mrf.mxu1  ;;  %v1169_v49 = vadd.f32 %v1168_v36, %v1124_v48 }
 0x3e7   : > { %v1198_v50 = vadd.f32 %v1197_v37, %v1124_v48 }
 0x3e8   : > { %v1268_v58 = vmax.f32 %v1169_v49, 0.0 }
 0x3e9   : > { %v1269_v59 = vmax.f32 %v1198_v50, 0.0 }
 0x3ed   : > { %v1171_v38 = vpop.f32.mrf.mxu0 }
 0x3ee   : > { %v1200_v39 = vpop.f32.mrf.mxu1  ;;  %v1172_v44 = vadd.f32 %v1171_v38, %v1129_v41 }
 0x3ef   : > { %v1201_v45 = vadd.f32 %v1200_v39, %v1129_v41 }
 0x3f0   : > { %v1272_v56 = vmax.f32 %v1172_v44, 0.0 }
 0x3f1   : > { %v1273_v57 = vmax.f32 %v1201_v45, 0.0  ;;  %v1293_v45 = vpop.permute.xlu0 %1292 }
 0x3f5   : > { %v1174_v42 = vpop.f32.mrf.mxu0 }
 0x3f6   : > { %v1203_v43 = vpop.f32.mrf.mxu1  ;;  %v1175_v46 = vadd.f32 %v1174_v42, %v1134_v40 }
 0x3f7   : > { %v1204_v47 = vadd.f32 %v1203_v43, %v1134_v40 }
 0x3f8   : > { %v1276_v51 = vmax.f32 %v1175_v46, 0.0 }
 0x3f9   : > { %v1277_v52 = vmax.f32 %v1204_v47, 0.0 }
 0x3fa   : > { %1334 = vmatpush.msra.mxu0 %v1276_v51 }
 0x3fb   : > { %1363 = vmatpush.msra.mxu1 %v1277_v52 }
 0x3fc   : > { %1335 = vmatpush.msra.mxu0 %v1272_v56 }
 0x3fd   : > { %1364 = vmatpush.msra.mxu1 %v1273_v57 }
 0x3fe   : > { %1336 = vmatpush.msra.mxu0 %v1268_v58  ;;  %v2216_v58 = vld [vmem:[%s2945_s1 + $0xf0] sm:$0xff] }
 0x3ff   : > { %1365 = vmatpush.msra.mxu1 %v1269_v59 }
 0x400   : > { %1337 = vmatpush.msra.mxu0 %v1264_v60 }
 0x401   : > { %1366 = vmatpush.msra.mxu1 %v1265_v61  ;;  %2198 = vmatmul.msk.f32.vlgmr.msra.gmra.mxu0 %vm265_vm0, %v2190_v62  ;;  %v2217_v61 = vld [vmem:[%s2945_s1 + $0xf8] sm:$0xff] }
 0x402   : > { %v1223_v63 = vpop.f32.mrf.mxu2  ;;  %2202 = vmatmul.msk.f32.vlgmr.msra.gmra.mxu1 %vm265_vm0, %v2190_v62 }
 0x403   : > { %v1252_v0 = vpop.f32.mrf.mxu3  ;;  %v1224_v18 = vadd.f32 %v1223_v63, %v1119_v53 }
 0x404   : > { %v1253_v19 = vadd.f32 %v1252_v0, %v1119_v53 }
 0x405   : > { %v1266_v24 = vmax.f32 %v1224_v18, 0.0 }
 0x406   : > { %v1267_v25 = vmax.f32 %v1253_v19, 0.0 }
 0x409   : > { %2199 = vmatmul.msk.f32.gmra.mxu0 %vm265_vm0, %v2191_v1 }
 0x40a   : > { %v1226_v2 = vpop.f32.mrf.mxu2  ;;  %2203 = vmatmul.msk.f32.gmra.mxu1 %vm265_vm0, %v2191_v1 }
 0x40b   : > { %v1255_v3 = vpop.f32.mrf.mxu3  ;;  %v1227_v14 = vadd.f32 %v1226_v2, %v1124_v48 }
 0x40c   : > { %v1256_v15 = vadd.f32 %v1255_v3, %v1124_v48 }
 0x40d   : > { %v1270_v22 = vmax.f32 %v1227_v14, 0.0 }
 0x40e   : > { %v1271_v23 = vmax.f32 %v1256_v15, 0.0 }
 0x411   : > { %2200 = vmatmul.msk.f32.gmra.mxu0 %vm265_vm0, %v2192_v4 }
 0x412   : > { %v1229_v5 = vpop.f32.mrf.mxu2  ;;  %2204 = vmatmul.msk.f32.gmra.mxu1 %vm265_vm0, %v2192_v4 }
 0x413   : > { %v1258_v6 = vpop.f32.mrf.mxu3  ;;  %v1230_v10 = vadd.f32 %v1229_v5, %v1129_v41 }
 0x414   : > { %v1259_v11 = vadd.f32 %v1258_v6, %v1129_v41 }
 0x415   : > { %v1274_v20 = vmax.f32 %v1230_v10, 0.0 }
 0x416   : > { %v1275_v21 = vmax.f32 %v1259_v11, 0.0 }
 0x419   : > { %2201 = vmatmul.msk.f32.gmra.mxu0 %vm265_vm0, %v2193_v7 }
 0x41a   : > { %v1232_v8 = vpop.f32.mrf.mxu2  ;;  %2205 = vmatmul.msk.f32.gmra.mxu1 %vm265_vm0, %v2193_v7 }
 0x41b   : > { %v1261_v9 = vpop.f32.mrf.mxu3  ;;  %v1233_v12 = vadd.f32 %v1232_v8, %v1134_v40 }
 0x41c   : > { %v1262_v13 = vadd.f32 %v1261_v9, %v1134_v40  ;;  %v1298_v40 = vpop.permute.xlu2 %1297 }
 0x41d   : > { %v1278_v16 = vmax.f32 %v1233_v12, 0.0 }
 0x41e   : > { %v1279_v17 = vmax.f32 %v1262_v13, 0.0 }
 0x41f   : > { %1392 = vmatpush.msra.mxu2 %v1278_v16 }
 0x420   : > { %1421 = vmatpush.msra.mxu3 %v1279_v17 }
 0x421   : > { %1393 = vmatpush.msra.mxu2 %v1274_v20 }
 0x422   : > { %1422 = vmatpush.msra.mxu3 %v1275_v21 }
 0x423   : > { %1394 = vmatpush.msra.mxu2 %v1270_v22 }
 0x424   : > { %1423 = vmatpush.msra.mxu3 %v1271_v23 }
 0x425   : > { %1395 = vmatpush.msra.mxu2 %v1266_v24  ;;  %v1482_v24 = vpop.permute.xlu1 %1481 }
 0x426   : > { %1424 = vmatpush.msra.mxu3 %v1267_v25  ;;  %2206 = vmatmul.msk.f32.vlgmr.msra.gmra.mxu2 %vm265_vm0, %v2190_v62  ;;  %v1477_v25 = vpop.permute.xlu2 %1476 }
 0x427   : > { %2210 = vmatmul.msk.f32.vlgmr.msra.gmra.mxu3 %vm265_vm0, %v2190_v62 }
 0x42e   : > { %2207 = vmatmul.msk.f32.gmra.mxu2 %vm265_vm0, %v2191_v1 }
 0x42f   : > { %2211 = vmatmul.msk.f32.gmra.mxu3 %vm265_vm0, %v2191_v1 }
 0x436   : > { %2208 = vmatmul.msk.f32.gmra.mxu2 %vm265_vm0, %v2192_v4 }
 0x437   : > { %2212 = vmatmul.msk.f32.gmra.mxu3 %vm265_vm0, %v2192_v4 }
 0x43e   : > { %2209 = vmatmul.msk.f32.gmra.mxu2 %vm265_vm0, %v2193_v7 }
 0x43f   : > { %2213 = vmatmul.msk.f32.gmra.mxu3 %vm265_vm0, %v2193_v7 }
 0x47e   : > { %v1339_v26 = vpop.f32.mrf.mxu0 }
 0x47f   : > { %v1368_v27 = vpop.f32.mrf.mxu1  ;;  %v1340_v46 = vadd.f32 %v1339_v26, %v1293_v45 }
 0x480   : > { %v1369_v47 = vadd.f32 %v1368_v27, %v1293_v45 }
 0x481   : > { %v1438_v52 = vmax.f32 %v1340_v46, 0.0  ;;  %v2238_v46 = vld [vmem:[%s2945_s1 + $0x100] sm:$0xff] }
 0x482   : > { %v1439_v53 = vmax.f32 %v1369_v47, 0.0  ;;  %v2239_v47 = vld [vmem:[%s2945_s1 + $0x108] sm:$0xff] }
 0x486   : > { %v1342_v28 = vpop.f32.mrf.mxu0 }
 0x487   : > { %v1371_v29 = vpop.f32.mrf.mxu1  ;;  %v1343_v41 = vadd.f32 %v1342_v28, %v1298_v40 }
 0x488   : > { %v1372_v42 = vadd.f32 %v1371_v29, %v1298_v40 }
 0x489   : > { %v1442_v50 = vmax.f32 %v1343_v41, 0.0 }
 0x48a   : > { %v1443_v51 = vmax.f32 %v1372_v42, 0.0 }
 0x48e   : > { %v1345_v30 = vpop.f32.mrf.mxu0 }
 0x48f   : > { %v1374_v31 = vpop.f32.mrf.mxu1  ;;  %v1346_v36 = vadd.f32 %v1345_v30, %v1303_v33 }
 0x490   : > { %v1375_v37 = vadd.f32 %v1374_v31, %v1303_v33 }
 0x491   : > { %v1446_v48 = vmax.f32 %v1346_v36, 0.0 }
 0x492   : > { %v1447_v49 = vmax.f32 %v1375_v37, 0.0  ;;  %v1467_v37 = vpop.permute.xlu1 %1466 }
 0x496   : > { %v1348_v34 = vpop.f32.mrf.mxu0 }
 0x497   : > { %v1377_v35 = vpop.f32.mrf.mxu1  ;;  %v1349_v38 = vadd.f32 %v1348_v34, %v1308_v32 }
 0x498   : > { %v1378_v39 = vadd.f32 %v1377_v35, %v1308_v32 }
 0x499   : > { %v1450_v43 = vmax.f32 %v1349_v38, 0.0 }
 0x49a   : > { %v1451_v44 = vmax.f32 %v1378_v39, 0.0 }
 0x49b   : > { %1508 = vmatpush.msrb.mxu0 %v1450_v43 }
 0x49c   : > { %1537 = vmatpush.msrb.mxu1 %v1451_v44 }
 0x49d   : > { %1509 = vmatpush.msrb.mxu0 %v1446_v48 }
 0x49e   : > { %1538 = vmatpush.msrb.mxu1 %v1447_v49 }
 0x49f   : > { %1510 = vmatpush.msrb.mxu0 %v1442_v50  ;;  %v2240_v50 = vld [vmem:[%s2945_s1 + $0x110] sm:$0xff] }
 0x4a0   : > { %1539 = vmatpush.msrb.mxu1 %v1443_v51 }
 0x4a1   : > { %1511 = vmatpush.msrb.mxu0 %v1438_v52 }
 0x4a2   : > { %1540 = vmatpush.msrb.mxu1 %v1439_v53  ;;  %2222 = vmatmul.msk.f32.vlgmr.msrb.gmra.mxu0 %vm265_vm0, %v2214_v54  ;;  %v2241_v53 = vld [vmem:[%s2945_s1 + $0x118] sm:$0xff] }
 0x4a3   : > { %2226 = vmatmul.msk.f32.vlgmr.msrb.gmra.mxu1 %vm265_vm0, %v2214_v54 }
 0x4a9   : > { %v1397_v56 = vpop.f32.mrf.mxu2 }
 0x4aa   : > { %v1426_v57 = vpop.f32.mrf.mxu3  ;;  %2223 = vmatmul.msk.f32.gmra.mxu0 %vm265_vm0, %v2215_v55  ;;  %v1398_v10 = vadd.f32 %v1397_v56, %v1293_v45 }
 0x4ab   : > { %2227 = vmatmul.msk.f32.gmra.mxu1 %vm265_vm0, %v2215_v55  ;;  %v1427_v11 = vadd.f32 %v1426_v57, %v1293_v45 }
 0x4ac   : > { %v1440_v16 = vmax.f32 %v1398_v10, 0.0 }
 0x4ad   : > { %v1441_v17 = vmax.f32 %v1427_v11, 0.0 }
 0x4b1   : > { %v1400_v59 = vpop.f32.mrf.mxu2 }
 0x4b2   : > { %v1429_v60 = vpop.f32.mrf.mxu3  ;;  %2224 = vmatmul.msk.f32.gmra.mxu0 %vm265_vm0, %v2216_v58  ;;  %v1401_v6 = vadd.f32 %v1400_v59, %v1298_v40 }
 0x4b3   : > { %2228 = vmatmul.msk.f32.gmra.mxu1 %vm265_vm0, %v2216_v58  ;;  %v1430_v7 = vadd.f32 %v1429_v60, %v1298_v40 }
 0x4b4   : > { %v1444_v14 = vmax.f32 %v1401_v6, 0.0 }
 0x4b5   : > { %v1445_v15 = vmax.f32 %v1430_v7, 0.0 }
 0x4b9   : > { %v1403_v62 = vpop.f32.mrf.mxu2 }
 0x4ba   : > { %v1432_v63 = vpop.f32.mrf.mxu3  ;;  %2225 = vmatmul.msk.f32.gmra.mxu0 %vm265_vm0, %v2217_v61  ;;  %v1404_v2 = vadd.f32 %v1403_v62, %v1303_v33 }
 0x4bb   : > { %2229 = vmatmul.msk.f32.gmra.mxu1 %vm265_vm0, %v2217_v61  ;;  %v1433_v3 = vadd.f32 %v1432_v63, %v1303_v33 }
 0x4bc   : > { %v1448_v12 = vmax.f32 %v1404_v2, 0.0 }
 0x4bd   : > { %v1449_v13 = vmax.f32 %v1433_v3, 0.0 }
 0x4c1   : > { %v1406_v0 = vpop.f32.mrf.mxu2 }
 0x4c2   : > { %v1435_v1 = vpop.f32.mrf.mxu3  ;;  %v1407_v4 = vadd.f32 %v1406_v0, %v1308_v32 }
 0x4c3   : > { %v1436_v5 = vadd.f32 %v1435_v1, %v1308_v32  ;;  %v1472_v32 = vpop.permute.xlu0 %1471 }
 0x4c4   : > { %v1452_v8 = vmax.f32 %v1407_v4, 0.0 }
 0x4c5   : > { %v1453_v9 = vmax.f32 %v1436_v5, 0.0 }
 0x4c6   : > { %1566 = vmatpush.msrb.mxu2 %v1452_v8 }
 0x4c7   : > { %1595 = vmatpush.msrb.mxu3 %v1453_v9 }
 0x4c8   : > { %1567 = vmatpush.msrb.mxu2 %v1448_v12 }
 0x4c9   : > { %1596 = vmatpush.msrb.mxu3 %v1449_v13 }
 0x4ca   : > { %1568 = vmatpush.msrb.mxu2 %v1444_v14 }
 0x4cb   : > { %1597 = vmatpush.msrb.mxu3 %v1445_v15 }
 0x4cc   : > { %1569 = vmatpush.msrb.mxu2 %v1440_v16  ;;  %v1656_v16 = vpop.permute.xlu2 %1655 }
 0x4cd   : > { %1598 = vmatpush.msrb.mxu3 %v1441_v17  ;;  %2230 = vmatmul.msk.f32.vlgmr.msrb.gmra.mxu2 %vm265_vm0, %v2214_v54  ;;  %v1651_v17 = vpop.permute.xlu0 %1650 }
 0x4ce   : > { %2234 = vmatmul.msk.f32.vlgmr.msrb.gmra.mxu3 %vm265_vm0, %v2214_v54 }
 0x4d5   : > { %2231 = vmatmul.msk.f32.gmra.mxu2 %vm265_vm0, %v2215_v55 }
 0x4d6   : > { %2235 = vmatmul.msk.f32.gmra.mxu3 %vm265_vm0, %v2215_v55 }
 0x4dd   : > { %2232 = vmatmul.msk.f32.gmra.mxu2 %vm265_vm0, %v2216_v58 }
 0x4de   : > { %2236 = vmatmul.msk.f32.gmra.mxu3 %vm265_vm0, %v2216_v58 }
 0x4e5   : > { %2233 = vmatmul.msk.f32.gmra.mxu2 %vm265_vm0, %v2217_v61 }
 0x4e6   : > { %2237 = vmatmul.msk.f32.gmra.mxu3 %vm265_vm0, %v2217_v61 }
 0x51f   : > { %v1513_v18 = vpop.f32.mrf.mxu0 }
 0x520   : > { %v1542_v19 = vpop.f32.mrf.mxu1  ;;  %v1514_v38 = vadd.f32 %v1513_v18, %v1467_v37 }
 0x521   : > { %v1543_v39 = vadd.f32 %v1542_v19, %v1467_v37 }
 0x522   : > { %v1612_v44 = vmax.f32 %v1514_v38, 0.0  ;;  %v2262_v38 = vld [vmem:[%s2945_s1 + $0x120] sm:$0xff] }
 0x523   : > { %v1613_v45 = vmax.f32 %v1543_v39, 0.0 }
 0x527   : > { %v1516_v20 = vpop.f32.mrf.mxu0 }
 0x528   : > { %v1545_v21 = vpop.f32.mrf.mxu1  ;;  %v1517_v33 = vadd.f32 %v1516_v20, %v1472_v32 }
 0x529   : > { %v1546_v34 = vadd.f32 %v1545_v21, %v1472_v32 }
 0x52a   : > { %v1616_v42 = vmax.f32 %v1517_v33, 0.0 }
 0x52b   : > { %v1617_v43 = vmax.f32 %v1546_v34, 0.0 }
 0x52f   : > { %v1519_v22 = vpop.f32.mrf.mxu0 }
 0x530   : > { %v1548_v23 = vpop.f32.mrf.mxu1  ;;  %v1520_v28 = vadd.f32 %v1519_v22, %v1477_v25 }
 0x531   : > { %v1549_v29 = vadd.f32 %v1548_v23, %v1477_v25 }
 0x532   : > { %v1620_v40 = vmax.f32 %v1520_v28, 0.0 }
 0x533   : > { %v1621_v41 = vmax.f32 %v1549_v29, 0.0  ;;  %v1641_v29 = vpop.permute.xlu2 %1640 }
 0x537   : > { %v1522_v26 = vpop.f32.mrf.mxu0 }
 0x538   : > { %v1551_v27 = vpop.f32.mrf.mxu1  ;;  %v1523_v30 = vadd.f32 %v1522_v26, %v1482_v24 }
 0x539   : > { %v1552_v31 = vadd.f32 %v1551_v27, %v1482_v24 }
 0x53a   : > { %v1624_v35 = vmax.f32 %v1523_v30, 0.0 }
 0x53b   : > { %v1625_v36 = vmax.f32 %v1552_v31, 0.0 }
 0x53c   : > { %1682 = vmatpush.msra.mxu0 %v1624_v35 }
 0x53d   : > { %1711 = vmatpush.msra.mxu1 %v1625_v36 }
 0x53e   : > { %1683 = vmatpush.msra.mxu0 %v1620_v40 }
 0x53f   : > { %1712 = vmatpush.msra.mxu1 %v1621_v41  ;;  %v2263_v41 = vld [vmem:[%s2945_s1 + $0x128] sm:$0xff] }
 0x540   : > { %1684 = vmatpush.msra.mxu0 %v1616_v42 }
 0x541   : > { %1713 = vmatpush.msra.mxu1 %v1617_v43 }
 0x542   : > { %1685 = vmatpush.msra.mxu0 %v1612_v44  ;;  %v2264_v44 = vld [vmem:[%s2945_s1 + $0x130] sm:$0xff] }
 0x543   : > { %1714 = vmatpush.msra.mxu1 %v1613_v45  ;;  %2246 = vmatmul.msk.f32.vlgmr.msra.gmra.mxu0 %vm265_vm0, %v2238_v46 }
 0x544   : > { %2250 = vmatmul.msk.f32.vlgmr.msra.gmra.mxu1 %vm265_vm0, %v2238_v46 }
 0x54b   : > { %2247 = vmatmul.msk.f32.gmra.mxu0 %vm265_vm0, %v2239_v47 }
 0x54c   : > { %2251 = vmatmul.msk.f32.gmra.mxu1 %vm265_vm0, %v2239_v47 }
 0x550   : > { %v1571_v48 = vpop.f32.mrf.mxu2 }
 0x551   : > { %v1600_v49 = vpop.f32.mrf.mxu3  ;;  %v1572_v2 = vadd.f32 %v1571_v48, %v1467_v37 }
 0x552   : > { %v1601_v3 = vadd.f32 %v1600_v49, %v1467_v37 }
 0x553   : > { %2248 = vmatmul.msk.f32.gmra.mxu0 %vm265_vm0, %v2240_v50  ;;  %v1614_v8 = vmax.f32 %v1572_v2, 0.0 }
 0x554   : > { %2252 = vmatmul.msk.f32.gmra.mxu1 %vm265_vm0, %v2240_v50  ;;  %v1615_v9 = vmax.f32 %v1601_v3, 0.0 }
 0x558   : > { %v1574_v51 = vpop.f32.mrf.mxu2 }
 0x559   : > { %v1603_v52 = vpop.f32.mrf.mxu3  ;;  %v1575_v62 = vadd.f32 %v1574_v51, %v1472_v32 }
 0x55a   : > { %v1604_v63 = vadd.f32 %v1603_v52, %v1472_v32 }
 0x55b   : > { %2249 = vmatmul.msk.f32.gmra.mxu0 %vm265_vm0, %v2241_v53  ;;  %v1618_v6 = vmax.f32 %v1575_v62, 0.0 }
 0x55c   : > { %2253 = vmatmul.msk.f32.gmra.mxu1 %vm265_vm0, %v2241_v53  ;;  %v1619_v7 = vmax.f32 %v1604_v63, 0.0 }
 0x560   : > { %v1577_v54 = vpop.f32.mrf.mxu2 }
 0x561   : > { %v1606_v55 = vpop.f32.mrf.mxu3  ;;  %v1578_v58 = vadd.f32 %v1577_v54, %v1477_v25 }
 0x562   : > { %v1607_v59 = vadd.f32 %v1606_v55, %v1477_v25 }
 0x563   : > { %v1622_v4 = vmax.f32 %v1578_v58, 0.0 }
 0x564   : > { %v1623_v5 = vmax.f32 %v1607_v59, 0.0 }
 0x568   : > { %v1580_v56 = vpop.f32.mrf.mxu2 }
 0x569   : > { %v1609_v57 = vpop.f32.mrf.mxu3  ;;  %v1581_v60 = vadd.f32 %v1580_v56, %v1482_v24 }
 0x56a   : > { %v1610_v61 = vadd.f32 %v1609_v57, %v1482_v24  ;;  %v1646_v24 = vpop.permute.xlu1 %1645 }
 0x56b   : > { %v1626_v0 = vmax.f32 %v1581_v60, 0.0 }
 0x56c   : > { %v1627_v1 = vmax.f32 %v1610_v61, 0.0 }
 0x56d   : > { %1740 = vmatpush.msra.mxu2 %v1626_v0 }
 0x56e   : > { %1769 = vmatpush.msra.mxu3 %v1627_v1 }
 0x56f   : > { %1741 = vmatpush.msra.mxu2 %v1622_v4 }
 0x570   : > { %1770 = vmatpush.msra.mxu3 %v1623_v5 }
 0x571   : > { %1742 = vmatpush.msra.mxu2 %v1618_v6 }
 0x572   : > { %1771 = vmatpush.msra.mxu3 %v1619_v7 }
 0x573   : > { %1743 = vmatpush.msra.mxu2 %v1614_v8 }
 0x574   : > { %1772 = vmatpush.msra.mxu3 %v1615_v9  ;;  %2254 = vmatmul.msk.f32.vlgmr.msra.gmra.mxu2 %vm265_vm0, %v2238_v46 }
 0x575   : > { %2258 = vmatmul.msk.f32.vlgmr.msra.gmra.mxu3 %vm265_vm0, %v2238_v46 }
 0x57c   : > { %2255 = vmatmul.msk.f32.gmra.mxu2 %vm265_vm0, %v2239_v47 }
 0x57d   : > { %2259 = vmatmul.msk.f32.gmra.mxu3 %vm265_vm0, %v2239_v47  ;;  %v2265_v47 = vld [vmem:[%s2945_s1 + $0x138] sm:$0xff] }
 0x584   : > { %2256 = vmatmul.msk.f32.gmra.mxu2 %vm265_vm0, %v2240_v50 }
 0x585   : > { %2260 = vmatmul.msk.f32.gmra.mxu3 %vm265_vm0, %v2240_v50 }
 0x58c   : > { %2257 = vmatmul.msk.f32.gmra.mxu2 %vm265_vm0, %v2241_v53 }
 0x58d   : > { %2261 = vmatmul.msk.f32.gmra.mxu3 %vm265_vm0, %v2241_v53 }
 0x5c0   : > { %v1687_v10 = vpop.f32.mrf.mxu0 }
 0x5c1   : > { %v1716_v11 = vpop.f32.mrf.mxu1  ;;  %v1688_v30 = vadd.f32 %v1687_v10, %v1641_v29  ;;  %v1815_v10 = vpop.permute.xlu0 %1814 }
 0x5c2   : > { %v1717_v31 = vadd.f32 %v1716_v11, %v1641_v29 }
 0x5c3   : > { %v1786_v36 = vmax.f32 %v1688_v30, 0.0 }
 0x5c4   : > { %v1787_v37 = vmax.f32 %v1717_v31, 0.0 }
 0x5c8   : > { %v1690_v12 = vpop.f32.mrf.mxu0 }
 0x5c9   : > { %v1719_v13 = vpop.f32.mrf.mxu1  ;;  %v1691_v25 = vadd.f32 %v1690_v12, %v1646_v24 }
 0x5ca   : > { %v1720_v26 = vadd.f32 %v1719_v13, %v1646_v24 }
 0x5cb   : > { %v1790_v34 = vmax.f32 %v1691_v25, 0.0 }
 0x5cc   : > { %v1791_v35 = vmax.f32 %v1720_v26, 0.0 }
 0x5d0   : > { %v1693_v14 = vpop.f32.mrf.mxu0 }
 0x5d1   : > { %v1722_v15 = vpop.f32.mrf.mxu1  ;;  %v1694_v20 = vadd.f32 %v1693_v14, %v1651_v17  ;;  %v1959_v14 = vlaneseq }
 0x5d2   : > { %v1723_v21 = vadd.f32 %v1722_v15, %v1651_v17 }
 0x5d3   : > { %v1794_v32 = vmax.f32 %v1694_v20, 0.0  ;;  %vm1961_vm4 = vcmp.lt.s32.totalorder %v1959_v14, 512 }
 0x5d4   : > { %v1795_v33 = vmax.f32 %v1723_v21, 0.0 }
 0x5d8   : > { %v1696_v18 = vpop.f32.mrf.mxu0 }
 0x5d9   : > { %v1725_v19 = vpop.f32.mrf.mxu1  ;;  %v1697_v22 = vadd.f32 %v1696_v18, %v1656_v16 }
 0x5da   : > { %v1726_v23 = vadd.f32 %v1725_v19, %v1656_v16 }
 0x5db   : > { %v1798_v27 = vmax.f32 %v1697_v22, 0.0 }
 0x5dc   : > { %v1799_v28 = vmax.f32 %v1726_v23, 0.0 }
 0x5dd   : > { %1853 = vmatpush.msrb.mxu0 %v1798_v27 }
 0x5de   : > { %1879 = vmatpush.msrb.mxu1 %v1799_v28 }
 0x5df   : > { %1854 = vmatpush.msrb.mxu0 %v1794_v32 }
 0x5e0   : > { %1880 = vmatpush.msrb.mxu1 %v1795_v33 }
 0x5e1   : > { %1855 = vmatpush.msrb.mxu0 %v1790_v34 }
 0x5e2   : > { %1881 = vmatpush.msrb.mxu1 %v1791_v35 }
 0x5e3   : > { %1856 = vmatpush.msrb.mxu0 %v1786_v36 }
 0x5e4   : > { %1882 = vmatpush.msrb.mxu1 %v1787_v37  ;;  %2270 = vmatmul.msk.f32.vlgmr.msrb.gmra.mxu0 %vm265_vm0, %v2262_v38 }
 0x5e5   : > { %2274 = vmatmul.msk.f32.vlgmr.msrb.gmra.mxu1 %vm265_vm0, %v2262_v38 }
 0x5ec   : > { %2271 = vmatmul.msk.f32.gmra.mxu0 %vm265_vm0, %v2263_v41 }
 0x5ed   : > { %2275 = vmatmul.msk.f32.gmra.mxu1 %vm265_vm0, %v2263_v41 }
 0x5f4   : > { %2272 = vmatmul.msk.f32.gmra.mxu0 %vm265_vm0, %v2264_v44 }
 0x5f5   : > { %2276 = vmatmul.msk.f32.gmra.mxu1 %vm265_vm0, %v2264_v44 }
 0x5f7   : > { %v1745_v39 = vpop.f32.mrf.mxu2 }
 0x5f8   : > { %v1774_v40 = vpop.f32.mrf.mxu3  ;;  %v1746_v58 = vadd.f32 %v1745_v39, %v1641_v29 }
 0x5f9   : > { %v1775_v59 = vadd.f32 %v1774_v40, %v1641_v29 }
 0x5fa   : > { %v1788_v0 = vmax.f32 %v1746_v58, 0.0 }
 0x5fb   : > { %v1789_v1 = vmax.f32 %v1775_v59, 0.0 }
 0x5fc   : > { %2273 = vmatmul.msk.f32.gmra.mxu0 %vm265_vm0, %v2265_v47 }
 0x5fd   : > { %2277 = vmatmul.msk.f32.gmra.mxu1 %vm265_vm0, %v2265_v47 }
 0x5ff   : > { %v1748_v42 = vpop.f32.mrf.mxu2 }
 0x600   : > { %v1777_v43 = vpop.f32.mrf.mxu3  ;;  %v1749_v54 = vadd.f32 %v1748_v42, %v1646_v24 }
 0x601   : > { %v1778_v55 = vadd.f32 %v1777_v43, %v1646_v24 }
 0x602   : > { %v1792_v62 = vmax.f32 %v1749_v54, 0.0 }
 0x603   : > { %v1793_v63 = vmax.f32 %v1778_v55, 0.0 }
 0x607   : > { %v1751_v45 = vpop.f32.mrf.mxu2 }
 0x608   : > { %v1780_v46 = vpop.f32.mrf.mxu3  ;;  %v1752_v50 = vadd.f32 %v1751_v45, %v1651_v17 }
 0x609   : > { %v1781_v51 = vadd.f32 %v1780_v46, %v1651_v17 }
 0x60a   : > { %v1796_v60 = vmax.f32 %v1752_v50, 0.0 }
 0x60b   : > { %v1797_v61 = vmax.f32 %v1781_v51, 0.0 }
 0x60f   : > { %v1754_v48 = vpop.f32.mrf.mxu2 }
 0x610   : > { %v1783_v49 = vpop.f32.mrf.mxu3  ;;  %v1755_v52 = vadd.f32 %v1754_v48, %v1656_v16 }
 0x611   : > { %v1784_v53 = vadd.f32 %v1783_v49, %v1656_v16 }
 0x612   : > { %v1800_v56 = vmax.f32 %v1755_v52, 0.0 }
 0x613   : > { %v1801_v57 = vmax.f32 %v1784_v53, 0.0 }
 0x614   : > { %1905 = vmatpush.msrb.mxu2 %v1800_v56 }
 0x615   : > { %1931 = vmatpush.msrb.mxu3 %v1801_v57 }
 0x616   : > { %1906 = vmatpush.msrb.mxu2 %v1796_v60 }
 0x617   : > { %1932 = vmatpush.msrb.mxu3 %v1797_v61 }
 0x618   : > { %1907 = vmatpush.msrb.mxu2 %v1792_v62 }
 0x619   : > { %1933 = vmatpush.msrb.mxu3 %v1793_v63 }
 0x61a   : > { %1908 = vmatpush.msrb.mxu2 %v1788_v0 }
 0x61b   : > { %1934 = vmatpush.msrb.mxu3 %v1789_v1  ;;  %2278 = vmatmul.msk.f32.vlgmr.msrb.gmra.mxu2 %vm265_vm0, %v2262_v38 }
 0x61c   : > { %2282 = vmatmul.msk.f32.vlgmr.msrb.gmra.mxu3 %vm265_vm0, %v2262_v38 }
 0x623   : > { %2279 = vmatmul.msk.f32.gmra.mxu2 %vm265_vm0, %v2263_v41 }
 0x624   : > { %2283 = vmatmul.msk.f32.gmra.mxu3 %vm265_vm0, %v2263_v41 }
 0x62b   : > { %2280 = vmatmul.msk.f32.gmra.mxu2 %vm265_vm0, %v2264_v44 }
 0x62c   : > { %2284 = vmatmul.msk.f32.gmra.mxu3 %vm265_vm0, %v2264_v44 }
 0x633   : > { %2281 = vmatmul.msk.f32.gmra.mxu2 %vm265_vm0, %v2265_v47 }
 0x634   : > { %2285 = vmatmul.msk.f32.gmra.mxu3 %vm265_vm0, %v2265_v47 }
 0x661   : > { %v1858_v2 = vpop.f32.mrf.mxu0 }
 0x662   : > { %v1884_v3 = vpop.f32.mrf.mxu1  ;;  %v1859_v18 = vadd.f32 %v1858_v2, %v1815_v10 }
 0x663   : > { %v1885_v11 = vadd.f32 %v1884_v3, %v1815_v10 }
 0x665   : > { %v1949_v15 = vrot.slane %v1885_v11, 7 }
 0x667   : > { %v1953_v21 = vsel %vm1952_vm1, %v1859_v18, %v1949_v15 }
 0x669   : > { %v1861_v4 = vpop.f32.mrf.mxu0 }
 0x66a   : > { %v1887_v5 = vpop.f32.mrf.mxu1 }
 0x671   : > { %v1863_v6 = vpop.f32.mrf.mxu0 }
 0x672   : > { %v1889_v7 = vpop.f32.mrf.mxu1 }
 0x679   : > { %v1865_v8 = vpop.f32.mrf.mxu0 }
 0x67a   : > { %v1891_v9 = vpop.f32.mrf.mxu1 }
 0x69e   : > { %v1910_v12 = vpop.f32.mrf.mxu2 }
 0x69f   : > { %v1936_v13 = vpop.f32.mrf.mxu3  ;;  %v1911_v16 = vadd.f32 %v1910_v12, %v1815_v10 }
 0x6a0   : > { %v1937_v17 = vadd.f32 %v1936_v13, %v1815_v10 }
 0x6a1   : > { %v1950_v19 = vrot.slane %v1911_v16, 6 }
 0x6a2   : > { %v1951_v20 = vrot.slane %v1937_v17, 5 }
 0x6a4   : > { %v1955_v22 = vsel %vm1954_vm2, %v1950_v19, %v1951_v20 }
 0x6a5   : > { %v1957_v23 = vsel %vm1956_vm3, %v1953_v21, %v1955_v22 }
 0x6a6   : > { %1963 = vst.msk [vmem:[%s218_s19] sm:$0xf] %vm1961_vm4, %v1957_v23  ;;  %v1913_v24 = vpop.f32.mrf.mxu2 }
 0x6a7   : > { %v1939_v25 = vpop.f32.mrf.mxu3 }
 0x6a8   : > { %2361 = shalt.err (!%p2358_p5)
}
 0x6a9   : > { %2291 = dma.vmem_to_hbm [thread:$0]  (%p2457_p6), %s1978_s20, 64, %s1980_s24, %s1965_s16  }
 0x6ae   : > { %v1915_v26 = vpop.f32.mrf.mxu2 }
 0x6af   : > { %v1941_v27 = vpop.f32.mrf.mxu3 }
 0x6b6   : > { %v1917_v28 = vpop.f32.mrf.mxu2 }
 0x6b7   : > { %v1943_v29 = vpop.f32.mrf.mxu3 }
 0x6b8 PF: > { %s1991_s8 = sand.u32 1, %s2384_s12   ;;  %p2294_p7 = pnand %p2047_p9, %p2461_p8 }
 0x6b9   : > { %s1992_s5 = scalar_lea.sflag [#allocation4], %s1991_s8 }
 0x6ba   : > { %p2295_p10 = pneg %p2294_p7 }
 0x6bc   : > { %2379 = dma.done.wait (%p2295_p10), %s1992_s5, 64  }
 0x6bd   : > { %2381 = vsyncadd (%p2295_p10), %s1992_s5, 4294967232  ;;  %p13_p6 = scmp.ge.s32.totalorder %s2442_s18, 4   ;;  %s2950_s12 = smov %s2388_s13 }
 0x6be   : > { %s2951_s13 = smov %s2392_s14  ;;  %s2952_s14 = smov %s2455_s21 }
 0x6bf   : > { %s2953_s15 = smov %s2442_s18  ;;  %15 = sbr.rel (!%p13_p6) target bundleno = 3 (0x3), region = 113 }
 0x6c4   :  { %1998 = vsyncpa [#allocation4], 1 }
 0x6c5   :  { %2000 = vsyncpa [#allocation4 + $0x1], 1 }

</bundles_post_ra>
